<compile_context>
chip_gen: v5e
topology: v5e:2x2
jax: 0.10.0
libtpu: 0.0.40
codegen_flags: <defaults>
</compile_context>

<pallas_src>
import numpy as np
import jax
import jax.numpy as jnp
from jax.experimental import pallas as pl
from jax.experimental.pallas import tpu as pltpu


# ----------------------------------------------------------------------------
# In-kernel helpers
# ----------------------------------------------------------------------------
def _reduce_rows(x, op):
    # Reduce a small, static number of sublane rows with plain VPU ops
    # (keeps a (1, TN) keepdims shape, avoids cross-sublane reduce lowering;
    # row counts here are <= K1 + K2, i.e. tiny).
    acc = x[0:1]
    for r in range(1, x.shape[0]):
        acc = op(acc, x[r:r + 1])
    return acc


def _make_mp_head_kernel(C, K0, K1, K2, NC):
    # static row/column offsets of the packed parameter slabs
    # head order inside the slabs: RM0 | RM1 | RM2 | RM1_ | RM2_ | (cls in w1/b1)
    o_rm1 = K0
    o_rm2 = K0 + K1
    o_rm1p = K0 + K1 + K2
    o_rm2p = K0 + 2 * K1 + K2
    o_cls = K0 + 2 * K1 + 2 * K2

    def kernel(x_ref, w1_ref, w1t_ref, w2_ref, b1_ref, sh_ref,
               feat_ref, cl0_ref, cl1_ref, cl1p_ref, cl2_ref, cl2p_ref, lg_ref):
        x = x_ref[0]                                    # (C, TN) f32
        xb = x.astype(jnp.bfloat16)

        def conv1(xb_in, row0, nk):
            w = w1_ref[row0:row0 + nk]                  # (nk, C) bf16
            b = b1_ref[row0:row0 + nk]                  # (nk, 1) f32
            return jnp.dot(w, xb_in, preferred_element_type=jnp.float32) + b

        def refine_tail(x_in, fc, col0, nk, head):
            # softmax over the cluster axis (temp = 0.5)
            s = fc * 0.5
            s = s - _reduce_rows(s, jnp.maximum)
            e = jnp.exp(s)
            seg = e * pl.reciprocal(_reduce_rows(e, jnp.add), approx=True)
            # torch.bmm(conv1.weight.T, seg)  -> (C, TN)
            rf = jnp.dot(w1t_ref[:, col0:col0 + nk], seg.astype(jnp.bfloat16),
                         preferred_element_type=jnp.float32)
            rf = jnp.maximum(rf, 0.0)
            # conv2 (1x1, no bias) with SyncBN eval scale folded into the weight
            y = jnp.dot(w2_ref[head], rf.astype(jnp.bfloat16),
                        preferred_element_type=jnp.float32)
            y = y + sh_ref[head * C:(head + 1) * C]
            y = 0.5 * (y + x_in)                        # residual mix
            return jnp.maximum(y, 0.0)                  # ReLU

        # ---- RM0 on the raw feature -------------------------------------
        fc0 = conv1(xb, 0, K0)
        cl0_ref[0] = fc0                                # store immediately
        acc = refine_tail(x, fc0, 0, K0, 0)

        # ---- argmax mask c0 (float index used multiplicatively, as in
        #      PyTorch's feature.mul(c0); first maximal index on ties) ------
        idxf = jax.lax.broadcasted_iota(jnp.int32, fc0.shape, 0).astype(jnp.float32)
        mx = _reduce_rows(fc0, jnp.maximum)
        mask = _reduce_rows(jnp.where(fc0 == mx, idxf, float(K0)), jnp.minimum)
        inv = 1.0 - mask                                # ones_like(c0) - c0

        xm = x * mask
        xi = x * inv
        xmb = xm.astype(jnp.bfloat16)
        xib = xi.astype(jnp.bfloat16)

        # ---- RM1 / RM2 on feature*c0 (fused conv1) ------------------------
        fcm = conv1(xmb, o_rm1, K1 + K2)
        fc1 = fcm[0:K1]
        fc2 = fcm[K1:K1 + K2]
        cl1_ref[0] = fc1
        cl2_ref[0] = fc2
        acc = acc + (refine_tail(xm, fc1, o_rm1, K1, 1)
                     + refine_tail(xm, fc2, o_rm2, K2, 2)) * mask

        # ---- RM1_ / RM2_ on feature*(1-c0) (fused conv1) ------------------
        fci = conv1(xib, o_rm1p, K1 + K2)
        fc1p = fci[0:K1]
        fc2p = fci[K1:K1 + K2]
        cl1p_ref[0] = fc1p
        cl2p_ref[0] = fc2p
        acc = acc + (refine_tail(xi, fc1p, o_rm1p, K1, 3)
                     + refine_tail(xi, fc2p, o_rm2p, K2, 4)) * inv

        feat = acc * (1.0 / 3.0)
        feat_ref[0] = feat

        # ---- cls_conv (1x1 + bias) -----------------------------------------
        lg = jnp.dot(w1_ref[o_cls:o_cls + NC], feat.astype(jnp.bfloat16),
                     preferred_element_type=jnp.float32) + b1_ref[o_cls:o_cls + NC]
        lg_ref[0] = lg

    return kernel


# ----------------------------------------------------------------------------
# Bilinear x4 upsample (align_corners=True, as nn.UpsamplingBilinear2d)
# ----------------------------------------------------------------------------
def _bilinear_matrix_align_corners(n_in, n_out):
    M = np.zeros((n_out, n_in), dtype=np.float32)
    if n_in == 1:
        M[:, 0] = 1.0
        return M
    scale = (n_in - 1) / (n_out - 1)
    for i in range(n_out):
        src = i * scale
        i0 = min(int(np.floor(src)), n_in - 2)
        f = src - i0
        M[i, i0] = 1.0 - f
        M[i, i0 + 1] = f
    return M


def upsample4_bilinear(x):
    # x: (B, NC, H, W) -> (B, NC, 4H, 4W); channels batched inside one grid step.
    B, NC, H, W = x.shape
    Ho, Wo = 4 * H, 4 * W
    A = jnp.asarray(_bilinear_matrix_align_corners(H, Ho))        # (Ho, H)
    BT = jnp.asarray(_bilinear_matrix_align_corners(W, Wo).T)     # (W, Wo)

    # split channels into groups only if the per-step output block gets too big
    cg = NC if NC * Ho * Wo * 4 <= (8 << 20) else 1
    while NC % cg:
        cg -= 1

    def kernel(a_ref, bt_ref, x_ref, o_ref):
        xv = x_ref[0]                                              # (cg, H, W)
        t = jnp.dot(xv.reshape(cg * H, W), bt_ref[...],
                    preferred_element_type=jnp.float32)            # W-direction
        t = t.reshape(cg, H, Wo)
        a_b = jnp.broadcast_to(a_ref[...][None], (cg, Ho, H))
        o_ref[0] = jax.lax.dot_general(                            # H-direction
            a_b, t, (((2,), (1,)), ((0,), (0,))),
            preferred_element_type=jnp.float32)                    # (cg, Ho, Wo)

    return pl.pallas_call(
        kernel,
        out_shape=jax.ShapeDtypeStruct((B, NC, Ho, Wo), jnp.float32),
        grid=(B, NC // cg),
        in_specs=[pl.BlockSpec((Ho, H), lambda b, g: (0, 0)),
                  pl.BlockSpec((W, Wo), lambda b, g: (0, 0)),
                  pl.BlockSpec((1, cg, H, W), lambda b, g: (b, g, 0, 0))],
        out_specs=pl.BlockSpec((1, cg, Ho, Wo), lambda b, g: (b, g, 0, 0)),
        compiler_params=pltpu.CompilerParams(
            dimension_semantics=("parallel", "parallel")),
    )(A, BT, x)


# ----------------------------------------------------------------------------
# Wrapper (layout plumbing + pallas_call)
# ----------------------------------------------------------------------------
def mp_head_forward(feature_nchw, rm_params, cls_w, cls_b, *, tile_n=512):
    """rm_params = [RM0, RM1, RM1_, RM2, RM2_]; each entry is
    (w1 (K,C), b1 (K,), w2 (C,C), bn_scale (C,), bn_shift (C,)).
    cls_w: (NUM_CLASSES, C), cls_b: (NUM_CLASSES,)."""
    B, C, H, W = feature_nchw.shape
    N = H * W
    NC = cls_w.shape[0]
    K0 = rm_params[0][0].shape[0]
    K1 = rm_params[1][0].shape[0]
    K2 = rm_params[3][0].shape[0]

    # internal head order RM0, RM1, RM2, RM1_, RM2_ (makes the fused conv1
    # weight slices contiguous); results are returned in the PyTorch order.
    ps = [rm_params[i] for i in (0, 1, 3, 2, 4)]

    # packed parameter slabs (matmul operands in bf16, biases/shifts in f32)
    w1_all = jnp.concatenate([p[0] for p in ps] + [cls_w], axis=0).astype(jnp.bfloat16)
    w1t_all = jnp.concatenate([p[0].T for p in ps], axis=1).astype(jnp.bfloat16)
    w2_all = jnp.stack([p[2] * p[3][:, None] for p in ps]).astype(jnp.bfloat16)  # BN scale folded
    b1_all = jnp.concatenate([p[1] for p in ps] + [cls_b]).reshape(-1, 1).astype(jnp.float32)
    sh_all = jnp.concatenate([p[4] for p in ps]).reshape(-1, 1).astype(jnp.float32)

    # channel-major feature view (pure reshape of NCHW, no transpose)
    x = feature_nchw.reshape(B, C, N).astype(jnp.float32)
    if N >= tile_n:
        tn = tile_n
        n_pad = pl.cdiv(N, tn) * tn
        if n_pad != N:
            x = jnp.pad(x, ((0, 0), (0, 0), (0, n_pad - N)))
    else:
        tn = N
        n_pad = N

    kernel = _make_mp_head_kernel(C, K0, K1, K2, NC)
    out_ch = (C, K0, K1, K1, K2, K2, NC)   # feat, cl0, cl1, cl1_, cl2, cl2_, logits

    outs = pl.pallas_call(
        kernel,
        out_shape=tuple(jax.ShapeDtypeStruct((B, c, n_pad), jnp.float32)
                        for c in out_ch),
        grid=(B, n_pad // tn),
        in_specs=[pl.BlockSpec((1, C, tn), lambda b, j: (b, 0, j)),
                  pl.BlockSpec(w1_all.shape, lambda b, j: (0, 0)),
                  pl.BlockSpec(w1t_all.shape, lambda b, j: (0, 0)),
                  pl.BlockSpec(w2_all.shape, lambda b, j: (0, 0, 0)),
                  pl.BlockSpec(b1_all.shape, lambda b, j: (0, 0)),
                  pl.BlockSpec(sh_all.shape, lambda b, j: (0, 0))],
        out_specs=tuple(pl.BlockSpec((1, c, tn), lambda b, j: (b, 0, j))
                        for c in out_ch),
        compiler_params=pltpu.CompilerParams(
            dimension_semantics=("parallel", "parallel")),
    )(x, w1_all, w1t_all, w2_all, b1_all, sh_all)

    def to_nchw(a):
        # (B, c, n_pad) -> (B, c, H, W): drop column padding + reshape (no transpose)
        return a[:, :, :N].reshape(B, a.shape[1], H, W)

    feat, cl0, cl1, cl1p, cl2, cl2p, logits = outs
    result = upsample4_bilinear(to_nchw(logits))
    return to_nchw(feat), [to_nchw(c) for c in (cl0, cl1, cl1p, cl2, cl2p)], result


# ----------------------------------------------------------------------------
# Deterministic parameter init (kaiming_normal fan_out, as in MP.__init__)
# ----------------------------------------------------------------------------
def _kaiming_conv1x1(key, out_c, in_c):
    std = float(np.sqrt(2.0 / out_c))          # fan_out of a 1x1 conv = out_c
    return (std * jax.random.normal(key, (out_c, in_c))).astype(jnp.float32)


def _conv_bias(key, out_c, in_c):
    bound = float(1.0 / np.sqrt(in_c))
    return jax.random.uniform(key, (out_c,), jnp.float32, -bound, bound)


def make_refine_params(key, c, k):
    k1, k2, k3 = jax.random.split(key, 3)
    w1 = _kaiming_conv1x1(k1, k, c)            # conv1.weight squeezed: (K, C)
    b1 = _conv_bias(k2, k, c)                  # conv1.bias: (K,)
    w2 = _kaiming_conv1x1(k3, c, c)            # conv2[0].weight: (C, C)
    eps = 1e-5                                 # SyncBN eval: gamma=1, beta=0, mean=0, var=1
    bn_scale = jnp.full((c,), 1.0 / np.sqrt(1.0 + eps), jnp.float32)
    bn_shift = jnp.zeros((c,), jnp.float32)
    return (w1, b1, w2, bn_scale, bn_shift)


if __name__ == "__main__":
    B, C, H, W = 2, 32, 8, 8          # cfg.MODEL_ASPP_OUTDIM = 32 (small)
    K0, K1, K2 = 2, 4, 8              # cfg.Cluster0 / Cluster1 / Cluster2
    NUM_CLASSES = 8                   # cfg.MODEL_NUM_CLASSES

    root = jax.random.PRNGKey(0)
    kx, k0, k1, k1p, k2, k2p, kc, kcb = jax.random.split(root, 8)

    feature = jax.random.normal(kx, (B, C, H, W), jnp.float32)
    rm_params = [make_refine_params(k0, C, K0),
                 make_refine_params(k1, C, K1),
                 make_refine_params(k1p, C, K1),
                 make_refine_params(k2, C, K2),
                 make_refine_params(k2p, C, K2)]
    cls_w = _kaiming_conv1x1(kc, NUM_CLASSES, C)
    cls_b = _conv_bias(kcb, NUM_CLASSES, C)

    feat, clusters, result = mp_head_forward(feature, rm_params, cls_w, cls_b)
    jax.block_until_ready((feat, clusters, result))

    assert feat.shape == (B, C, H, W)
    assert [tuple(c.shape) for c in clusters] == [(B, K0, H, W), (B, K1, H, W),
                                                  (B, K1, H, W), (B, K2, H, W),
                                                  (B, K2, H, W)]
    assert result.shape == (B, NUM_CLASSES, 4 * H, 4 * W)
    assert all(bool(jnp.isfinite(a).all()) for a in [feat, result] + clusters)
    print("KERNEL_OK")
</pallas_src>

<mosaic_0001>
module attributes {stable_mosaic.version = 11 : i64} {
  func.func @kernel(%arg0: i32, %arg1: i32, %arg2: memref<1x32x64xf32, #tpu.memory_space<vmem>>, %arg3: memref<34x32xbf16, #tpu.memory_space<vmem>>, %arg4: memref<32x26xbf16, #tpu.memory_space<vmem>>, %arg5: memref<5x32x32xbf16, #tpu.memory_space<vmem>>, %arg6: memref<34x1xf32, #tpu.memory_space<vmem>>, %arg7: memref<160x1xf32, #tpu.memory_space<vmem>>, %arg8: memref<1x32x64xf32, #tpu.memory_space<vmem>>, %arg9: memref<1x2x64xf32, #tpu.memory_space<vmem>>, %arg10: memref<1x4x64xf32, #tpu.memory_space<vmem>>, %arg11: memref<1x4x64xf32, #tpu.memory_space<vmem>>, %arg12: memref<1x8x64xf32, #tpu.memory_space<vmem>>, %arg13: memref<1x8x64xf32, #tpu.memory_space<vmem>>, %arg14: memref<1x8x64xf32, #tpu.memory_space<vmem>>) attributes {dimension_semantics = [#tpu.dimension_semantics<parallel>, #tpu.dimension_semantics<parallel>], iteration_bounds = array<i64: 2, 1>, scalar_prefetch = 0 : i64, scratch_operands = 0 : i64, tpu.core_type = #tpu.core_type<tc>, window_params = [{transform_indices = @transform_0, window_bounds = array<i64: 1, 32, 64>}, {pipeline_mode = #tpu.pipeline_mode<synchronous>, transform_indices = @transform_1, window_bounds = array<i64: 34, 32>}, {pipeline_mode = #tpu.pipeline_mode<synchronous>, transform_indices = @transform_2, window_bounds = array<i64: 32, 26>}, {pipeline_mode = #tpu.pipeline_mode<synchronous>, transform_indices = @transform_3, window_bounds = array<i64: 5, 32, 32>}, {pipeline_mode = #tpu.pipeline_mode<synchronous>, transform_indices = @transform_4, window_bounds = array<i64: 34, 1>}, {pipeline_mode = #tpu.pipeline_mode<synchronous>, transform_indices = @transform_5, window_bounds = array<i64: 160, 1>}, {transform_indices = @transform_6, window_bounds = array<i64: 1, 32, 64>}, {transform_indices = @transform_7, window_bounds = array<i64: 1, 2, 64>}, {transform_indices = @transform_8, window_bounds = array<i64: 1, 4, 64>}, {transform_indices = @transform_9, window_bounds = array<i64: 1, 4, 64>}, {transform_indices = @transform_10, window_bounds = array<i64: 1, 8, 64>}, {transform_indices = @transform_11, window_bounds = array<i64: 1, 8, 64>}, {transform_indices = @transform_12, window_bounds = array<i64: 1, 8, 64>}]} {
    %c0 = arith.constant 0 : index
    %c0_0 = arith.constant 0 : index
    %c0_1 = arith.constant 0 : index
    %0 = vector.load %arg2[%c0, %c0_0, %c0_1] : memref<1x32x64xf32, #tpu.memory_space<vmem>>, vector<1x32x64xf32>
    %1 = vector.shape_cast %0 : vector<1x32x64xf32> to vector<32x64xf32>
    %2 = arith.truncf %1 : vector<32x64xf32> to vector<32x64xbf16>
    %c0_2 = arith.constant 0 : index
    %c0_3 = arith.constant 0 : index
    %3 = vector.load %arg3[%c0_2, %c0_3] : memref<34x32xbf16, #tpu.memory_space<vmem>>, vector<2x32xbf16>
    %c0_4 = arith.constant 0 : index
    %c0_5 = arith.constant 0 : index
    %4 = vector.load %arg6[%c0_4, %c0_5] : memref<34x1xf32, #tpu.memory_space<vmem>>, vector<2x1xf32>
    %cst = arith.constant dense<0.000000e+00> : vector<2x64xf32>
    %5 = tpu.matmul %3, %2, %cst {dimension_numbers = #tpu.dot_dimension_numbers<[1], [0], [0], [1], [0, 0, 1, 1], [], []>} : vector<2x32xbf16>, vector<32x64xbf16>, vector<2x64xf32> -> vector<2x64xf32>
    %6 = vector.broadcast %4 : vector<2x1xf32> to vector<2x64xf32>
    %7 = arith.addf %5, %6 : vector<2x64xf32>
    %c0_6 = arith.constant 0 : index
    %c0_7 = arith.constant 0 : index
    %c0_8 = arith.constant 0 : index
    %8 = vector.load %arg9[%c0_6, %c0_7, %c0_8] : memref<1x2x64xf32, #tpu.memory_space<vmem>>, vector<1x2x64xf32>
    %9 = vector.shape_cast %8 : vector<1x2x64xf32> to vector<2x64xf32>
    %10 = vector.shape_cast %7 : vector<2x64xf32> to vector<1x2x64xf32>
    tpu.vector_store %arg9[%c0_6, %c0_7, %c0_8], %10 {strides = array<i32>} : memref<1x2x64xf32, #tpu.memory_space<vmem>>, vector<1x2x64xf32>,
    %cst_9 = arith.constant 5.000000e-01 : f32
    %11 = vector.broadcast %cst_9 : f32 to vector<2x64xf32>
    %12 = arith.mulf %7, %11 : vector<2x64xf32>
    %13 = vector.extract_strided_slice %12 {offsets = [0, 0], sizes = [1, 64], strides = [1, 1]} : vector<2x64xf32> to vector<1x64xf32>
    %14 = vector.extract_strided_slice %12 {offsets = [1, 0], sizes = [1, 64], strides = [1, 1]} : vector<2x64xf32> to vector<1x64xf32>
    %15 = arith.maximumf %13, %14 : vector<1x64xf32>
    %16 = vector.broadcast %15 : vector<1x64xf32> to vector<2x64xf32>
    %17 = arith.subf %12, %16 : vector<2x64xf32>
    %18 = math.exp %17 : vector<2x64xf32>
    %19 = vector.extract_strided_slice %18 {offsets = [0, 0], sizes = [1, 64], strides = [1, 1]} : vector<2x64xf32> to vector<1x64xf32>
    %20 = vector.extract_strided_slice %18 {offsets = [1, 0], sizes = [1, 64], strides = [1, 1]} : vector<2x64xf32> to vector<1x64xf32>
    %21 = arith.addf %19, %20 : vector<1x64xf32>
    %22 = tpu.reciprocal %21 {approx = true} : vector<1x64xf32> -> vector<1x64xf32>
    %23 = vector.broadcast %22 : vector<1x64xf32> to vector<2x64xf32>
    %24 = arith.mulf %18, %23 : vector<2x64xf32>
    %c0_10 = arith.constant 0 : index
    %c0_11 = arith.constant 0 : index
    %25 = vector.load %arg4[%c0_10, %c0_11] : memref<32x26xbf16, #tpu.memory_space<vmem>>, vector<32x2xbf16>
    %26 = arith.truncf %24 : vector<2x64xf32> to vector<2x64xbf16>
    %cst_12 = arith.constant dense<0.000000e+00> : vector<32x64xf32>
    %27 = tpu.matmul %25, %26, %cst_12 {dimension_numbers = #tpu.dot_dimension_numbers<[1], [0], [0], [1], [0, 0, 1, 1], [], []>} : vector<32x2xbf16>, vector<2x64xbf16>, vector<32x64xf32> -> vector<32x64xf32>
    %cst_13 = arith.constant 0.000000e+00 : f32
    %28 = vector.broadcast %cst_13 : f32 to vector<32x64xf32>
    %29 = arith.maximumf %27, %28 : vector<32x64xf32>
    %c0_14 = arith.constant 0 : index
    %c0_15 = arith.constant 0 : index
    %c0_16 = arith.constant 0 : index
    %30 = vector.load %arg5[%c0_14, %c0_15, %c0_16] : memref<5x32x32xbf16, #tpu.memory_space<vmem>>, vector<1x32x32xbf16>
    %31 = vector.shape_cast %30 : vector<1x32x32xbf16> to vector<32x32xbf16>
    %32 = arith.truncf %29 : vector<32x64xf32> to vector<32x64xbf16>
    %cst_17 = arith.constant dense<0.000000e+00> : vector<32x64xf32>
    %33 = tpu.matmul %31, %32, %cst_17 {dimension_numbers = #tpu.dot_dimension_numbers<[1], [0], [0], [1], [0, 0, 1, 1], [], []>} : vector<32x32xbf16>, vector<32x64xbf16>, vector<32x64xf32> -> vector<32x64xf32>
    %c0_18 = arith.constant 0 : index
    %c0_19 = arith.constant 0 : index
    %34 = vector.load %arg7[%c0_18, %c0_19] : memref<160x1xf32, #tpu.memory_space<vmem>>, vector<32x1xf32>
    %35 = vector.broadcast %34 : vector<32x1xf32> to vector<32x64xf32>
    %36 = arith.addf %33, %35 : vector<32x64xf32>
    %37 = arith.addf %36, %1 : vector<32x64xf32>
    %cst_20 = arith.constant 5.000000e-01 : f32
    %38 = vector.broadcast %cst_20 : f32 to vector<32x64xf32>
    %39 = arith.mulf %38, %37 : vector<32x64xf32>
    %cst_21 = arith.constant 0.000000e+00 : f32
    %40 = vector.broadcast %cst_21 : f32 to vector<32x64xf32>
    %41 = arith.maximumf %39, %40 : vector<32x64xf32>
    %42 = tpu.iota {dimensions = array<i32: 0>} : vector<2x64xi32>
    %43 = arith.sitofp %42 : vector<2x64xi32> to vector<2x64xf32>
    %44 = vector.extract_strided_slice %7 {offsets = [0, 0], sizes = [1, 64], strides = [1, 1]} : vector<2x64xf32> to vector<1x64xf32>
    %45 = vector.extract_strided_slice %7 {offsets = [1, 0], sizes = [1, 64], strides = [1, 1]} : vector<2x64xf32> to vector<1x64xf32>
    %46 = arith.maximumf %44, %45 : vector<1x64xf32>
    %47 = vector.broadcast %46 : vector<1x64xf32> to vector<2x64xf32>
    %48 = arith.cmpf oeq, %7, %47 : vector<2x64xf32>
    %cst_22 = arith.constant 2.000000e+00 : f32
    %49 = vector.broadcast %cst_22 : f32 to vector<2x64xf32>
    %50 = arith.select %48, %43, %49 : vector<2x64xi1>, vector<2x64xf32>
    %51 = vector.extract_strided_slice %50 {offsets = [0, 0], sizes = [1, 64], strides = [1, 1]} : vector<2x64xf32> to vector<1x64xf32>
    %52 = vector.extract_strided_slice %50 {offsets = [1, 0], sizes = [1, 64], strides = [1, 1]} : vector<2x64xf32> to vector<1x64xf32>
    %53 = arith.minimumf %51, %52 : vector<1x64xf32>
    %cst_23 = arith.constant 1.000000e+00 : f32
    %54 = vector.broadcast %cst_23 : f32 to vector<1x64xf32>
    %55 = arith.subf %54, %53 : vector<1x64xf32>
    %56 = vector.broadcast %53 : vector<1x64xf32> to vector<32x64xf32>
    %57 = arith.mulf %1, %56 : vector<32x64xf32>
    %58 = vector.broadcast %55 : vector<1x64xf32> to vector<32x64xf32>
    %59 = arith.mulf %1, %58 : vector<32x64xf32>
    %60 = arith.truncf %57 : vector<32x64xf32> to vector<32x64xbf16>
    %61 = arith.truncf %59 : vector<32x64xf32> to vector<32x64xbf16>
    %c2 = arith.constant 2 : index
    %c0_24 = arith.constant 0 : index
    %62 = vector.load %arg3[%c2, %c0_24] : memref<34x32xbf16, #tpu.memory_space<vmem>>, vector<12x32xbf16>
    %c2_25 = arith.constant 2 : index
    %c0_26 = arith.constant 0 : index
    %63 = vector.load %arg6[%c2_25, %c0_26] : memref<34x1xf32, #tpu.memory_space<vmem>>, vector<12x1xf32>
    %cst_27 = arith.constant dense<0.000000e+00> : vector<12x64xf32>
    %64 = tpu.matmul %62, %60, %cst_27 {dimension_numbers = #tpu.dot_dimension_numbers<[1], [0], [0], [1], [0, 0, 1, 1], [], []>} : vector<12x32xbf16>, vector<32x64xbf16>, vector<12x64xf32> -> vector<12x64xf32>
    %65 = vector.broadcast %63 : vector<12x1xf32> to vector<12x64xf32>
    %66 = arith.addf %64, %65 : vector<12x64xf32>
    %67 = vector.extract_strided_slice %66 {offsets = [0, 0], sizes = [4, 64], strides = [1, 1]} : vector<12x64xf32> to vector<4x64xf32>
    %68 = vector.extract_strided_slice %66 {offsets = [4, 0], sizes = [8, 64], strides = [1, 1]} : vector<12x64xf32> to vector<8x64xf32>
    %c0_28 = arith.constant 0 : index
    %c0_29 = arith.constant 0 : index
    %c0_30 = arith.constant 0 : index
    %69 = vector.load %arg10[%c0_28, %c0_29, %c0_30] : memref<1x4x64xf32, #tpu.memory_space<vmem>>, vector<1x4x64xf32>
    %70 = vector.shape_cast %69 : vector<1x4x64xf32> to vector<4x64xf32>
    %71 = vector.shape_cast %67 : vector<4x64xf32> to vector<1x4x64xf32>
    tpu.vector_store %arg10[%c0_28, %c0_29, %c0_30], %71 {strides = array<i32>} : memref<1x4x64xf32, #tpu.memory_space<vmem>>, vector<1x4x64xf32>,
    %c0_31 = arith.constant 0 : index
    %c0_32 = arith.constant 0 : index
    %c0_33 = arith.constant 0 : index
    %72 = vector.load %arg12[%c0_31, %c0_32, %c0_33] : memref<1x8x64xf32, #tpu.memory_space<vmem>>, vector<1x8x64xf32>
    %73 = vector.shape_cast %72 : vector<1x8x64xf32> to vector<8x64xf32>
    %74 = vector.shape_cast %68 : vector<8x64xf32> to vector<1x8x64xf32>
    tpu.vector_store %arg12[%c0_31, %c0_32, %c0_33], %74 {strides = array<i32>} : memref<1x8x64xf32, #tpu.memory_space<vmem>>, vector<1x8x64xf32>,
    %cst_34 = arith.constant 5.000000e-01 : f32
    %75 = vector.broadcast %cst_34 : f32 to vector<4x64xf32>
    %76 = arith.mulf %67, %75 : vector<4x64xf32>
    %77 = vector.extract_strided_slice %76 {offsets = [0, 0], sizes = [1, 64], strides = [1, 1]} : vector<4x64xf32> to vector<1x64xf32>
    %78 = vector.extract_strided_slice %76 {offsets = [1, 0], sizes = [1, 64], strides = [1, 1]} : vector<4x64xf32> to vector<1x64xf32>
    %79 = arith.maximumf %77, %78 : vector<1x64xf32>
    %80 = vector.extract_strided_slice %76 {offsets = [2, 0], sizes = [1, 64], strides = [1, 1]} : vector<4x64xf32> to vector<1x64xf32>
    %81 = arith.maximumf %79, %80 : vector<1x64xf32>
    %82 = vector.extract_strided_slice %76 {offsets = [3, 0], sizes = [1, 64], strides = [1, 1]} : vector<4x64xf32> to vector<1x64xf32>
    %83 = arith.maximumf %81, %82 : vector<1x64xf32>
    %84 = vector.broadcast %83 : vector<1x64xf32> to vector<4x64xf32>
    %85 = arith.subf %76, %84 : vector<4x64xf32>
    %86 = math.exp %85 : vector<4x64xf32>
    %87 = vector.extract_strided_slice %86 {offsets = [0, 0], sizes = [1, 64], strides = [1, 1]} : vector<4x64xf32> to vector<1x64xf32>
    %88 = vector.extract_strided_slice %86 {offsets = [1, 0], sizes = [1, 64], strides = [1, 1]} : vector<4x64xf32> to vector<1x64xf32>
    %89 = arith.addf %87, %88 : vector<1x64xf32>
    %90 = vector.extract_strided_slice %86 {offsets = [2, 0], sizes = [1, 64], strides = [1, 1]} : vector<4x64xf32> to vector<1x64xf32>
    %91 = arith.addf %89, %90 : vector<1x64xf32>
    %92 = vector.extract_strided_slice %86 {offsets = [3, 0], sizes = [1, 64], strides = [1, 1]} : vector<4x64xf32> to vector<1x64xf32>
    %93 = arith.addf %91, %92 : vector<1x64xf32>
    %94 = tpu.reciprocal %93 {approx = true} : vector<1x64xf32> -> vector<1x64xf32>
    %95 = vector.broadcast %94 : vector<1x64xf32> to vector<4x64xf32>
    %96 = arith.mulf %86, %95 : vector<4x64xf32>
    %c0_35 = arith.constant 0 : index
    %c2_36 = arith.constant 2 : index
    %97 = vector.load %arg4[%c0_35, %c2_36] : memref<32x26xbf16, #tpu.memory_space<vmem>>, vector<32x4xbf16>
    %98 = arith.truncf %96 : vector<4x64xf32> to vector<4x64xbf16>
    %cst_37 = arith.constant dense<0.000000e+00> : vector<32x64xf32>
    %99 = tpu.matmul %97, %98, %cst_37 {dimension_numbers = #tpu.dot_dimension_numbers<[1], [0], [0], [1], [0, 0, 1, 1], [], []>} : vector<32x4xbf16>, vector<4x64xbf16>, vector<32x64xf32> -> vector<32x64xf32>
    %cst_38 = arith.constant 0.000000e+00 : f32
    %100 = vector.broadcast %cst_38 : f32 to vector<32x64xf32>
    %101 = arith.maximumf %99, %100 : vector<32x64xf32>
    %c1 = arith.constant 1 : index
    %c0_39 = arith.constant 0 : index
    %c0_40 = arith.constant 0 : index
    %102 = vector.load %arg5[%c1, %c0_39, %c0_40] : memref<5x32x32xbf16, #tpu.memory_space<vmem>>, vector<1x32x32xbf16>
    %103 = vector.shape_cast %102 : vector<1x32x32xbf16> to vector<32x32xbf16>
    %104 = arith.truncf %101 : vector<32x64xf32> to vector<32x64xbf16>
    %cst_41 = arith.constant dense<0.000000e+00> : vector<32x64xf32>
    %105 = tpu.matmul %103, %104, %cst_41 {dimension_numbers = #tpu.dot_dimension_numbers<[1], [0], [0], [1], [0, 0, 1, 1], [], []>} : vector<32x32xbf16>, vector<32x64xbf16>, vector<32x64xf32> -> vector<32x64xf32>
    %c32 = arith.constant 32 : index
    %c0_42 = arith.constant 0 : index
    %106 = vector.load %arg7[%c32, %c0_42] : memref<160x1xf32, #tpu.memory_space<vmem>>, vector<32x1xf32>
    %107 = vector.broadcast %106 : vector<32x1xf32> to vector<32x64xf32>
    %108 = arith.addf %105, %107 : vector<32x64xf32>
    %109 = arith.addf %108, %57 : vector<32x64xf32>
    %cst_43 = arith.constant 5.000000e-01 : f32
    %110 = vector.broadcast %cst_43 : f32 to vector<32x64xf32>
    %111 = arith.mulf %110, %109 : vector<32x64xf32>
    %cst_44 = arith.constant 0.000000e+00 : f32
    %112 = vector.broadcast %cst_44 : f32 to vector<32x64xf32>
    %113 = arith.maximumf %111, %112 : vector<32x64xf32>
    %cst_45 = arith.constant 5.000000e-01 : f32
    %114 = vector.broadcast %cst_45 : f32 to vector<8x64xf32>
    %115 = arith.mulf %68, %114 : vector<8x64xf32>
    %116 = vector.extract_strided_slice %115 {offsets = [0, 0], sizes = [1, 64], strides = [1, 1]} : vector<8x64xf32> to vector<1x64xf32>
    %117 = vector.extract_strided_slice %115 {offsets = [1, 0], sizes = [1, 64], strides = [1, 1]} : vector<8x64xf32> to vector<1x64xf32>
    %118 = arith.maximumf %116, %117 : vector<1x64xf32>
    %119 = vector.extract_strided_slice %115 {offsets = [2, 0], sizes = [1, 64], strides = [1, 1]} : vector<8x64xf32> to vector<1x64xf32>
    %120 = arith.maximumf %118, %119 : vector<1x64xf32>
    %121 = vector.extract_strided_slice %115 {offsets = [3, 0], sizes = [1, 64], strides = [1, 1]} : vector<8x64xf32> to vector<1x64xf32>
    %122 = arith.maximumf %120, %121 : vector<1x64xf32>
    %123 = vector.extract_strided_slice %115 {offsets = [4, 0], sizes = [1, 64], strides = [1, 1]} : vector<8x64xf32> to vector<1x64xf32>
    %124 = arith.maximumf %122, %123 : vector<1x64xf32>
    %125 = vector.extract_strided_slice %115 {offsets = [5, 0], sizes = [1, 64], strides = [1, 1]} : vector<8x64xf32> to vector<1x64xf32>
    %126 = arith.maximumf %124, %125 : vector<1x64xf32>
    %127 = vector.extract_strided_slice %115 {offsets = [6, 0], sizes = [1, 64], strides = [1, 1]} : vector<8x64xf32> to vector<1x64xf32>
    %128 = arith.maximumf %126, %127 : vector<1x64xf32>
    %129 = vector.extract_strided_slice %115 {offsets = [7, 0], sizes = [1, 64], strides = [1, 1]} : vector<8x64xf32> to vector<1x64xf32>
    %130 = arith.maximumf %128, %129 : vector<1x64xf32>
    %131 = vector.broadcast %130 : vector<1x64xf32> to vector<8x64xf32>
    %132 = arith.subf %115, %131 : vector<8x64xf32>
    %133 = math.exp %132 : vector<8x64xf32>
    %134 = vector.extract_strided_slice %133 {offsets = [0, 0], sizes = [1, 64], strides = [1, 1]} : vector<8x64xf32> to vector<1x64xf32>
    %135 = vector.extract_strided_slice %133 {offsets = [1, 0], sizes = [1, 64], strides = [1, 1]} : vector<8x64xf32> to vector<1x64xf32>
    %136 = arith.addf %134, %135 : vector<1x64xf32>
    %137 = vector.extract_strided_slice %133 {offsets = [2, 0], sizes = [1, 64], strides = [1, 1]} : vector<8x64xf32> to vector<1x64xf32>
    %138 = arith.addf %136, %137 : vector<1x64xf32>
    %139 = vector.extract_strided_slice %133 {offsets = [3, 0], sizes = [1, 64], strides = [1, 1]} : vector<8x64xf32> to vector<1x64xf32>
    %140 = arith.addf %138, %139 : vector<1x64xf32>
    %141 = vector.extract_strided_slice %133 {offsets = [4, 0], sizes = [1, 64], strides = [1, 1]} : vector<8x64xf32> to vector<1x64xf32>
    %142 = arith.addf %140, %141 : vector<1x64xf32>
    %143 = vector.extract_strided_slice %133 {offsets = [5, 0], sizes = [1, 64], strides = [1, 1]} : vector<8x64xf32> to vector<1x64xf32>
    %144 = arith.addf %142, %143 : vector<1x64xf32>
    %145 = vector.extract_strided_slice %133 {offsets = [6, 0], sizes = [1, 64], strides = [1, 1]} : vector<8x64xf32> to vector<1x64xf32>
    %146 = arith.addf %144, %145 : vector<1x64xf32>
    %147 = vector.extract_strided_slice %133 {offsets = [7, 0], sizes = [1, 64], strides = [1, 1]} : vector<8x64xf32> to vector<1x64xf32>
    %148 = arith.addf %146, %147 : vector<1x64xf32>
    %149 = tpu.reciprocal %148 {approx = true} : vector<1x64xf32> -> vector<1x64xf32>
    %150 = vector.broadcast %149 : vector<1x64xf32> to vector<8x64xf32>
    %151 = arith.mulf %133, %150 : vector<8x64xf32>
    %c0_46 = arith.constant 0 : index
    %c6 = arith.constant 6 : index
    %152 = vector.load %arg4[%c0_46, %c6] : memref<32x26xbf16, #tpu.memory_space<vmem>>, vector<32x8xbf16>
    %153 = arith.truncf %151 : vector<8x64xf32> to vector<8x64xbf16>
    %cst_47 = arith.constant dense<0.000000e+00> : vector<32x64xf32>
    %154 = tpu.matmul %152, %153, %cst_47 {dimension_numbers = #tpu.dot_dimension_numbers<[1], [0], [0], [1], [0, 0, 1, 1], [], []>} : vector<32x8xbf16>, vector<8x64xbf16>, vector<32x64xf32> -> vector<32x64xf32>
    %cst_48 = arith.constant 0.000000e+00 : f32
    %155 = vector.broadcast %cst_48 : f32 to vector<32x64xf32>
    %156 = arith.maximumf %154, %155 : vector<32x64xf32>
    %c2_49 = arith.constant 2 : index
    %c0_50 = arith.constant 0 : index
    %c0_51 = arith.constant 0 : index
    %157 = vector.load %arg5[%c2_49, %c0_50, %c0_51] : memref<5x32x32xbf16, #tpu.memory_space<vmem>>, vector<1x32x32xbf16>
    %158 = vector.shape_cast %157 : vector<1x32x32xbf16> to vector<32x32xbf16>
    %159 = arith.truncf %156 : vector<32x64xf32> to vector<32x64xbf16>
    %cst_52 = arith.constant dense<0.000000e+00> : vector<32x64xf32>
    %160 = tpu.matmul %158, %159, %cst_52 {dimension_numbers = #tpu.dot_dimension_numbers<[1], [0], [0], [1], [0, 0, 1, 1], [], []>} : vector<32x32xbf16>, vector<32x64xbf16>, vector<32x64xf32> -> vector<32x64xf32>
    %c64 = arith.constant 64 : index
    %c0_53 = arith.constant 0 : index
    %161 = vector.load %arg7[%c64, %c0_53] : memref<160x1xf32, #tpu.memory_space<vmem>>, vector<32x1xf32>
    %162 = vector.broadcast %161 : vector<32x1xf32> to vector<32x64xf32>
    %163 = arith.addf %160, %162 : vector<32x64xf32>
    %164 = arith.addf %163, %57 : vector<32x64xf32>
    %cst_54 = arith.constant 5.000000e-01 : f32
    %165 = vector.broadcast %cst_54 : f32 to vector<32x64xf32>
    %166 = arith.mulf %165, %164 : vector<32x64xf32>
    %cst_55 = arith.constant 0.000000e+00 : f32
    %167 = vector.broadcast %cst_55 : f32 to vector<32x64xf32>
    %168 = arith.maximumf %166, %167 : vector<32x64xf32>
    %169 = arith.addf %113, %168 : vector<32x64xf32>
    %170 = vector.broadcast %53 : vector<1x64xf32> to vector<32x64xf32>
    %171 = arith.mulf %169, %170 : vector<32x64xf32>
    %172 = arith.addf %41, %171 : vector<32x64xf32>
    %c14 = arith.constant 14 : index
    %c0_56 = arith.constant 0 : index
    %173 = vector.load %arg3[%c14, %c0_56] : memref<34x32xbf16, #tpu.memory_space<vmem>>, vector<12x32xbf16>
    %c14_57 = arith.constant 14 : index
    %c0_58 = arith.constant 0 : index
    %174 = vector.load %arg6[%c14_57, %c0_58] : memref<34x1xf32, #tpu.memory_space<vmem>>, vector<12x1xf32>
    %cst_59 = arith.constant dense<0.000000e+00> : vector<12x64xf32>
    %175 = tpu.matmul %173, %61, %cst_59 {dimension_numbers = #tpu.dot_dimension_numbers<[1], [0], [0], [1], [0, 0, 1, 1], [], []>} : vector<12x32xbf16>, vector<32x64xbf16>, vector<12x64xf32> -> vector<12x64xf32>
    %176 = vector.broadcast %174 : vector<12x1xf32> to vector<12x64xf32>
    %177 = arith.addf %175, %176 : vector<12x64xf32>
    %178 = vector.extract_strided_slice %177 {offsets = [0, 0], sizes = [4, 64], strides = [1, 1]} : vector<12x64xf32> to vector<4x64xf32>
    %179 = vector.extract_strided_slice %177 {offsets = [4, 0], sizes = [8, 64], strides = [1, 1]} : vector<12x64xf32> to vector<8x64xf32>
    %c0_60 = arith.constant 0 : index
    %c0_61 = arith.constant 0 : index
    %c0_62 = arith.constant 0 : index
    %180 = vector.load %arg11[%c0_60, %c0_61, %c0_62] : memref<1x4x64xf32, #tpu.memory_space<vmem>>, vector<1x4x64xf32>
    %181 = vector.shape_cast %180 : vector<1x4x64xf32> to vector<4x64xf32>
    %182 = vector.shape_cast %178 : vector<4x64xf32> to vector<1x4x64xf32>
    tpu.vector_store %arg11[%c0_60, %c0_61, %c0_62], %182 {strides = array<i32>} : memref<1x4x64xf32, #tpu.memory_space<vmem>>, vector<1x4x64xf32>,
    %c0_63 = arith.constant 0 : index
    %c0_64 = arith.constant 0 : index
    %c0_65 = arith.constant 0 : index
    %183 = vector.load %arg13[%c0_63, %c0_64, %c0_65] : memref<1x8x64xf32, #tpu.memory_space<vmem>>, vector<1x8x64xf32>
    %184 = vector.shape_cast %183 : vector<1x8x64xf32> to vector<8x64xf32>
    %185 = vector.shape_cast %179 : vector<8x64xf32> to vector<1x8x64xf32>
    tpu.vector_store %arg13[%c0_63, %c0_64, %c0_65], %185 {strides = array<i32>} : memref<1x8x64xf32, #tpu.memory_space<vmem>>, vector<1x8x64xf32>,
    %cst_66 = arith.constant 5.000000e-01 : f32
    %186 = vector.broadcast %cst_66 : f32 to vector<4x64xf32>
    %187 = arith.mulf %178, %186 : vector<4x64xf32>
    %188 = vector.extract_strided_slice %187 {offsets = [0, 0], sizes = [1, 64], strides = [1, 1]} : vector<4x64xf32> to vector<1x64xf32>
    %189 = vector.extract_strided_slice %187 {offsets = [1, 0], sizes = [1, 64], strides = [1, 1]} : vector<4x64xf32> to vector<1x64xf32>
    %190 = arith.maximumf %188, %189 : vector<1x64xf32>
    %191 = vector.extract_strided_slice %187 {offsets = [2, 0], sizes = [1, 64], strides = [1, 1]} : vector<4x64xf32> to vector<1x64xf32>
    %192 = arith.maximumf %190, %191 : vector<1x64xf32>
    %193 = vector.extract_strided_slice %187 {offsets = [3, 0], sizes = [1, 64], strides = [1, 1]} : vector<4x64xf32> to vector<1x64xf32>
    %194 = arith.maximumf %192, %193 : vector<1x64xf32>
    %195 = vector.broadcast %194 : vector<1x64xf32> to vector<4x64xf32>
    %196 = arith.subf %187, %195 : vector<4x64xf32>
    %197 = math.exp %196 : vector<4x64xf32>
    %198 = vector.extract_strided_slice %197 {offsets = [0, 0], sizes = [1, 64], strides = [1, 1]} : vector<4x64xf32> to vector<1x64xf32>
    %199 = vector.extract_strided_slice %197 {offsets = [1, 0], sizes = [1, 64], strides = [1, 1]} : vector<4x64xf32> to vector<1x64xf32>
    %200 = arith.addf %198, %199 : vector<1x64xf32>
    %201 = vector.extract_strided_slice %197 {offsets = [2, 0], sizes = [1, 64], strides = [1, 1]} : vector<4x64xf32> to vector<1x64xf32>
    %202 = arith.addf %200, %201 : vector<1x64xf32>
    %203 = vector.extract_strided_slice %197 {offsets = [3, 0], sizes = [1, 64], strides = [1, 1]} : vector<4x64xf32> to vector<1x64xf32>
    %204 = arith.addf %202, %203 : vector<1x64xf32>
    %205 = tpu.reciprocal %204 {approx = true} : vector<1x64xf32> -> vector<1x64xf32>
    %206 = vector.broadcast %205 : vector<1x64xf32> to vector<4x64xf32>
    %207 = arith.mulf %197, %206 : vector<4x64xf32>
    %c0_67 = arith.constant 0 : index
    %c14_68 = arith.constant 14 : index
    %208 = vector.load %arg4[%c0_67, %c14_68] : memref<32x26xbf16, #tpu.memory_space<vmem>>, vector<32x4xbf16>
    %209 = arith.truncf %207 : vector<4x64xf32> to vector<4x64xbf16>
    %cst_69 = arith.constant dense<0.000000e+00> : vector<32x64xf32>
    %210 = tpu.matmul %208, %209, %cst_69 {dimension_numbers = #tpu.dot_dimension_numbers<[1], [0], [0], [1], [0, 0, 1, 1], [], []>} : vector<32x4xbf16>, vector<4x64xbf16>, vector<32x64xf32> -> vector<32x64xf32>
    %cst_70 = arith.constant 0.000000e+00 : f32
    %211 = vector.broadcast %cst_70 : f32 to vector<32x64xf32>
    %212 = arith.maximumf %210, %211 : vector<32x64xf32>
    %c3 = arith.constant 3 : index
    %c0_71 = arith.constant 0 : index
    %c0_72 = arith.constant 0 : index
    %213 = vector.load %arg5[%c3, %c0_71, %c0_72] : memref<5x32x32xbf16, #tpu.memory_space<vmem>>, vector<1x32x32xbf16>
    %214 = vector.shape_cast %213 : vector<1x32x32xbf16> to vector<32x32xbf16>
    %215 = arith.truncf %212 : vector<32x64xf32> to vector<32x64xbf16>
    %cst_73 = arith.constant dense<0.000000e+00> : vector<32x64xf32>
    %216 = tpu.matmul %214, %215, %cst_73 {dimension_numbers = #tpu.dot_dimension_numbers<[1], [0], [0], [1], [0, 0, 1, 1], [], []>} : vector<32x32xbf16>, vector<32x64xbf16>, vector<32x64xf32> -> vector<32x64xf32>
    %c96 = arith.constant 96 : index
    %c0_74 = arith.constant 0 : index
    %217 = vector.load %arg7[%c96, %c0_74] : memref<160x1xf32, #tpu.memory_space<vmem>>, vector<32x1xf32>
    %218 = vector.broadcast %217 : vector<32x1xf32> to vector<32x64xf32>
    %219 = arith.addf %216, %218 : vector<32x64xf32>
    %220 = arith.addf %219, %59 : vector<32x64xf32>
    %cst_75 = arith.constant 5.000000e-01 : f32
    %221 = vector.broadcast %cst_75 : f32 to vector<32x64xf32>
    %222 = arith.mulf %221, %220 : vector<32x64xf32>
    %cst_76 = arith.constant 0.000000e+00 : f32
    %223 = vector.broadcast %cst_76 : f32 to vector<32x64xf32>
    %224 = arith.maximumf %222, %223 : vector<32x64xf32>
    %cst_77 = arith.constant 5.000000e-01 : f32
    %225 = vector.broadcast %cst_77 : f32 to vector<8x64xf32>
    %226 = arith.mulf %179, %225 : vector<8x64xf32>
    %227 = vector.extract_strided_slice %226 {offsets = [0, 0], sizes = [1, 64], strides = [1, 1]} : vector<8x64xf32> to vector<1x64xf32>
    %228 = vector.extract_strided_slice %226 {offsets = [1, 0], sizes = [1, 64], strides = [1, 1]} : vector<8x64xf32> to vector<1x64xf32>
    %229 = arith.maximumf %227, %228 : vector<1x64xf32>
    %230 = vector.extract_strided_slice %226 {offsets = [2, 0], sizes = [1, 64], strides = [1, 1]} : vector<8x64xf32> to vector<1x64xf32>
    %231 = arith.maximumf %229, %230 : vector<1x64xf32>
    %232 = vector.extract_strided_slice %226 {offsets = [3, 0], sizes = [1, 64], strides = [1, 1]} : vector<8x64xf32> to vector<1x64xf32>
    %233 = arith.maximumf %231, %232 : vector<1x64xf32>
    %234 = vector.extract_strided_slice %226 {offsets = [4, 0], sizes = [1, 64], strides = [1, 1]} : vector<8x64xf32> to vector<1x64xf32>
    %235 = arith.maximumf %233, %234 : vector<1x64xf32>
    %236 = vector.extract_strided_slice %226 {offsets = [5, 0], sizes = [1, 64], strides = [1, 1]} : vector<8x64xf32> to vector<1x64xf32>
    %237 = arith.maximumf %235, %236 : vector<1x64xf32>
    %238 = vector.extract_strided_slice %226 {offsets = [6, 0], sizes = [1, 64], strides = [1, 1]} : vector<8x64xf32> to vector<1x64xf32>
    %239 = arith.maximumf %237, %238 : vector<1x64xf32>
    %240 = vector.extract_strided_slice %226 {offsets = [7, 0], sizes = [1, 64], strides = [1, 1]} : vector<8x64xf32> to vector<1x64xf32>
    %241 = arith.maximumf %239, %240 : vector<1x64xf32>
    %242 = vector.broadcast %241 : vector<1x64xf32> to vector<8x64xf32>
    %243 = arith.subf %226, %242 : vector<8x64xf32>
    %244 = math.exp %243 : vector<8x64xf32>
    %245 = vector.extract_strided_slice %244 {offsets = [0, 0], sizes = [1, 64], strides = [1, 1]} : vector<8x64xf32> to vector<1x64xf32>
    %246 = vector.extract_strided_slice %244 {offsets = [1, 0], sizes = [1, 64], strides = [1, 1]} : vector<8x64xf32> to vector<1x64xf32>
    %247 = arith.addf %245, %246 : vector<1x64xf32>
    %248 = vector.extract_strided_slice %244 {offsets = [2, 0], sizes = [1, 64], strides = [1, 1]} : vector<8x64xf32> to vector<1x64xf32>
    %249 = arith.addf %247, %248 : vector<1x64xf32>
    %250 = vector.extract_strided_slice %244 {offsets = [3, 0], sizes = [1, 64], strides = [1, 1]} : vector<8x64xf32> to vector<1x64xf32>
    %251 = arith.addf %249, %250 : vector<1x64xf32>
    %252 = vector.extract_strided_slice %244 {offsets = [4, 0], sizes = [1, 64], strides = [1, 1]} : vector<8x64xf32> to vector<1x64xf32>
    %253 = arith.addf %251, %252 : vector<1x64xf32>
    %254 = vector.extract_strided_slice %244 {offsets = [5, 0], sizes = [1, 64], strides = [1, 1]} : vector<8x64xf32> to vector<1x64xf32>
    %255 = arith.addf %253, %254 : vector<1x64xf32>
    %256 = vector.extract_strided_slice %244 {offsets = [6, 0], sizes = [1, 64], strides = [1, 1]} : vector<8x64xf32> to vector<1x64xf32>
    %257 = arith.addf %255, %256 : vector<1x64xf32>
    %258 = vector.extract_strided_slice %244 {offsets = [7, 0], sizes = [1, 64], strides = [1, 1]} : vector<8x64xf32> to vector<1x64xf32>
    %259 = arith.addf %257, %258 : vector<1x64xf32>
    %260 = tpu.reciprocal %259 {approx = true} : vector<1x64xf32> -> vector<1x64xf32>
    %261 = vector.broadcast %260 : vector<1x64xf32> to vector<8x64xf32>
    %262 = arith.mulf %244, %261 : vector<8x64xf32>
    %c0_78 = arith.constant 0 : index
    %c18 = arith.constant 18 : index
    %263 = vector.load %arg4[%c0_78, %c18] : memref<32x26xbf16, #tpu.memory_space<vmem>>, vector<32x8xbf16>
    %264 = arith.truncf %262 : vector<8x64xf32> to vector<8x64xbf16>
    %cst_79 = arith.constant dense<0.000000e+00> : vector<32x64xf32>
    %265 = tpu.matmul %263, %264, %cst_79 {dimension_numbers = #tpu.dot_dimension_numbers<[1], [0], [0], [1], [0, 0, 1, 1], [], []>} : vector<32x8xbf16>, vector<8x64xbf16>, vector<32x64xf32> -> vector<32x64xf32>
    %cst_80 = arith.constant 0.000000e+00 : f32
    %266 = vector.broadcast %cst_80 : f32 to vector<32x64xf32>
    %267 = arith.maximumf %265, %266 : vector<32x64xf32>
    %c4 = arith.constant 4 : index
    %c0_81 = arith.constant 0 : index
    %c0_82 = arith.constant 0 : index
    %268 = vector.load %arg5[%c4, %c0_81, %c0_82] : memref<5x32x32xbf16, #tpu.memory_space<vmem>>, vector<1x32x32xbf16>
    %269 = vector.shape_cast %268 : vector<1x32x32xbf16> to vector<32x32xbf16>
    %270 = arith.truncf %267 : vector<32x64xf32> to vector<32x64xbf16>
    %cst_83 = arith.constant dense<0.000000e+00> : vector<32x64xf32>
    %271 = tpu.matmul %269, %270, %cst_83 {dimension_numbers = #tpu.dot_dimension_numbers<[1], [0], [0], [1], [0, 0, 1, 1], [], []>} : vector<32x32xbf16>, vector<32x64xbf16>, vector<32x64xf32> -> vector<32x64xf32>
    %c128 = arith.constant 128 : index
    %c0_84 = arith.constant 0 : index
    %272 = vector.load %arg7[%c128, %c0_84] : memref<160x1xf32, #tpu.memory_space<vmem>>, vector<32x1xf32>
    %273 = vector.broadcast %272 : vector<32x1xf32> to vector<32x64xf32>
    %274 = arith.addf %271, %273 : vector<32x64xf32>
    %275 = arith.addf %274, %59 : vector<32x64xf32>
    %cst_85 = arith.constant 5.000000e-01 : f32
    %276 = vector.broadcast %cst_85 : f32 to vector<32x64xf32>
    %277 = arith.mulf %276, %275 : vector<32x64xf32>
    %cst_86 = arith.constant 0.000000e+00 : f32
    %278 = vector.broadcast %cst_86 : f32 to vector<32x64xf32>
    %279 = arith.maximumf %277, %278 : vector<32x64xf32>
    %280 = arith.addf %224, %279 : vector<32x64xf32>
    %281 = vector.broadcast %55 : vector<1x64xf32> to vector<32x64xf32>
    %282 = arith.mulf %280, %281 : vector<32x64xf32>
    %283 = arith.addf %172, %282 : vector<32x64xf32>
    %cst_87 = arith.constant 0.333333343 : f32
    %284 = vector.broadcast %cst_87 : f32 to vector<32x64xf32>
    %285 = arith.mulf %283, %284 : vector<32x64xf32>
    %c0_88 = arith.constant 0 : index
    %c0_89 = arith.constant 0 : index
    %c0_90 = arith.constant 0 : index
    %286 = vector.load %arg8[%c0_88, %c0_89, %c0_90] : memref<1x32x64xf32, #tpu.memory_space<vmem>>, vector<1x32x64xf32>
    %287 = vector.shape_cast %286 : vector<1x32x64xf32> to vector<32x64xf32>
    %288 = vector.shape_cast %285 : vector<32x64xf32> to vector<1x32x64xf32>
    tpu.vector_store %arg8[%c0_88, %c0_89, %c0_90], %288 {strides = array<i32>} : memref<1x32x64xf32, #tpu.memory_space<vmem>>, vector<1x32x64xf32>,
    %c26 = arith.constant 26 : index
    %c0_91 = arith.constant 0 : index
    %289 = vector.load %arg3[%c26, %c0_91] : memref<34x32xbf16, #tpu.memory_space<vmem>>, vector<8x32xbf16>
    %290 = arith.truncf %285 : vector<32x64xf32> to vector<32x64xbf16>
    %cst_92 = arith.constant dense<0.000000e+00> : vector<8x64xf32>
    %291 = tpu.matmul %289, %290, %cst_92 {dimension_numbers = #tpu.dot_dimension_numbers<[1], [0], [0], [1], [0, 0, 1, 1], [], []>} : vector<8x32xbf16>, vector<32x64xbf16>, vector<8x64xf32> -> vector<8x64xf32>
    %c26_93 = arith.constant 26 : index
    %c0_94 = arith.constant 0 : index
    %292 = vector.load %arg6[%c26_93, %c0_94] : memref<34x1xf32, #tpu.memory_space<vmem>>, vector<8x1xf32>
    %293 = vector.broadcast %292 : vector<8x1xf32> to vector<8x64xf32>
    %294 = arith.addf %291, %293 : vector<8x64xf32>
    %c0_95 = arith.constant 0 : index
    %c0_96 = arith.constant 0 : index
    %c0_97 = arith.constant 0 : index
    %295 = vector.load %arg14[%c0_95, %c0_96, %c0_97] : memref<1x8x64xf32, #tpu.memory_space<vmem>>, vector<1x8x64xf32>
    %296 = vector.shape_cast %295 : vector<1x8x64xf32> to vector<8x64xf32>
    %297 = vector.shape_cast %294 : vector<8x64xf32> to vector<1x8x64xf32>
    tpu.vector_store %arg14[%c0_95, %c0_96, %c0_97], %297 {strides = array<i32>} : memref<1x8x64xf32, #tpu.memory_space<vmem>>, vector<1x8x64xf32>,
    return
  }
  func.func @transform_0(%arg0: i32, %arg1: i32) -> (i32, i32, i32) {
    %c0_i32 = arith.constant 0 : i32
    %c0_i32_0 = arith.constant 0 : i32
    return %arg0, %c0_i32, %arg1 : i32, i32, i32
  }
  func.func @transform_1(%arg0: i32, %arg1: i32) -> (i32, i32) {
    %c0_i32 = arith.constant 0 : i32
    %c0_i32_0 = arith.constant 0 : i32
    %c0_i32_1 = arith.constant 0 : i32
    return %c0_i32, %c0_i32_0 : i32, i32
  }
  func.func @transform_2(%arg0: i32, %arg1: i32) -> (i32, i32) {
    %c0_i32 = arith.constant 0 : i32
    %c0_i32_0 = arith.constant 0 : i32
    %c0_i32_1 = arith.constant 0 : i32
    return %c0_i32, %c0_i32_0 : i32, i32
  }
  func.func @transform_3(%arg0: i32, %arg1: i32) -> (i32, i32, i32) {
    %c0_i32 = arith.constant 0 : i32
    %c0_i32_0 = arith.constant 0 : i32
    %c0_i32_1 = arith.constant 0 : i32
    %c0_i32_2 = arith.constant 0 : i32
    return %c0_i32, %c0_i32_0, %c0_i32_1 : i32, i32, i32
  }
  func.func @transform_4(%arg0: i32, %arg1: i32) -> (i32, i32) {
    %c0_i32 = arith.constant 0 : i32
    %c0_i32_0 = arith.constant 0 : i32
    %c0_i32_1 = arith.constant 0 : i32
    return %c0_i32, %c0_i32_0 : i32, i32
  }
  func.func @transform_5(%arg0: i32, %arg1: i32) -> (i32, i32) {
    %c0_i32 = arith.constant 0 : i32
    %c0_i32_0 = arith.constant 0 : i32
    %c0_i32_1 = arith.constant 0 : i32
    return %c0_i32, %c0_i32_0 : i32, i32
  }
  func.func @transform_6(%arg0: i32, %arg1: i32) -> (i32, i32, i32) {
    %c0_i32 = arith.constant 0 : i32
    %c0_i32_0 = arith.constant 0 : i32
    return %arg0, %c0_i32, %arg1 : i32, i32, i32
  }
  func.func @transform_7(%arg0: i32, %arg1: i32) -> (i32, i32, i32) {
    %c0_i32 = arith.constant 0 : i32
    %c0_i32_0 = arith.constant 0 : i32
    return %arg0, %c0_i32, %arg1 : i32, i32, i32
  }
  func.func @transform_8(%arg0: i32, %arg1: i32) -> (i32, i32, i32) {
    %c0_i32 = arith.constant 0 : i32
    %c0_i32_0 = arith.constant 0 : i32
    return %arg0, %c0_i32, %arg1 : i32, i32, i32
  }
  func.func @transform_9(%arg0: i32, %arg1: i32) -> (i32, i32, i32) {
    %c0_i32 = arith.constant 0 : i32
    %c0_i32_0 = arith.constant 0 : i32
    return %arg0, %c0_i32, %arg1 : i32, i32, i32
  }
  func.func @transform_10(%arg0: i32, %arg1: i32) -> (i32, i32, i32) {
    %c0_i32 = arith.constant 0 : i32
    %c0_i32_0 = arith.constant 0 : i32
    return %arg0, %c0_i32, %arg1 : i32, i32, i32
  }
  func.func @transform_11(%arg0: i32, %arg1: i32) -> (i32, i32, i32) {
    %c0_i32 = arith.constant 0 : i32
    %c0_i32_0 = arith.constant 0 : i32
    return %arg0, %c0_i32, %arg1 : i32, i32, i32
  }
  func.func @transform_12(%arg0: i32, %arg1: i32) -> (i32, i32, i32) {
    %c0_i32 = arith.constant 0 : i32
    %c0_i32_0 = arith.constant 0 : i32
    return %arg0, %c0_i32, %arg1 : i32, i32, i32
  }
}

</mosaic_0001>

<bundles_post_ra>
// kernel: tpu_custom_call.1
= control target key start
LH: loop header
LB: loop body
LE: loop exit
PB: predicated region body
PF: predicated region fallthrough
CT: control target
= control target key end

     0   :  { %s3113_s0 = inlined_call_operand.vmem [shape: f32[2,32,64], index: 0, kind: input, shape index: {}]   ;;  %s3114_s1 = inlined_call_operand.vmem [shape: bf16[34,32], index: 1, kind: input, shape index: {}]   ;;  %s3115_s2 = inlined_call_operand.vmem [shape: bf16[32,26], index: 2, kind: input, shape index: {}]   ;;  %s3116_s3 = inlined_call_operand.vmem [shape: bf16[5,32,32], index: 3, kind: input, shape index: {}]   ;;  %s3117_s4 = inlined_call_operand.vmem [shape: f32[34,1], index: 4, kind: input, shape index: {}]   ;;  %s3118_s5 = inlined_call_operand.vmem [shape: f32[160,1], index: 5, kind: input, shape index: {}]   ;;  %s3119_s6 = inlined_call_operand.hbm [shape: f32[2,32,64], index: 6, kind: output, shape index: {0}]   ;;  %s3120_s7 = inlined_call_operand.hbm [shape: f32[2,2,64], index: 7, kind: output, shape index: {1}]   ;;  %s3121_s8 = inlined_call_operand.hbm [shape: f32[2,4,64], index: 8, kind: output, shape index: {2}]   ;;  %s3122_s9 = inlined_call_operand.hbm [shape: f32[2,4,64], index: 9, kind: output, shape index: {3}]   ;;  %s3123_s10 = inlined_call_operand.hbm [shape: f32[2,8,64], index: 10, kind: output, shape index: {4}]   ;;  %s3124_s11 = inlined_call_operand.hbm [shape: f32[2,8,64], index: 11, kind: output, shape index: {5}]   ;;  %s3125_s12 = inlined_call_operand.hbm [shape: f32[2,8,64], index: 12, kind: output, shape index: {6}]  }
   0x1   :  { %3140 = sst [smem:[#allocation25_spill]] %s3113_s0 }
   0x2   :  { %3141 = sst [smem:[#allocation26_spill]] %s3114_s1 }
   0x3   :  { %3142 = sst [smem:[#allocation27_spill]] %s3115_s2 }
   0x4   :  { %3143 = sst [smem:[#allocation28_spill]] %s3116_s3 }
   0x5   :  { %3144 = sst [smem:[#allocation29_spill]] %s3117_s4 }
   0x6   :  { %3145 = sst [smem:[#allocation30_spill]] %s3118_s5 }
   0x7   :  { %3146 = sst [smem:[#allocation31_spill]] %s3123_s10 }
   0x8   :  { %3147 = sst [smem:[#allocation32_spill]] %s3125_s12 }
   0x9   :  { %18 = vsyncpa [#allocation3], 0 }
   0xa   :  { %20 = vsyncpa [#allocation3 + $0x1], 0 }
   0xb   :  { %21 = vsyncpa [#allocation5], 0 }
   0xc   :  { %23 = vsyncpa [#allocation5 + $0x1], 0 }
   0xd   :  { %24 = vsyncpa [#allocation8], 0 }
   0xe   :  { %26 = vsyncpa [#allocation8 + $0x1], 0 }
   0xf   :  { %27 = vsyncpa [#allocation11], 0 }
  0x10   :  { %29 = vsyncpa [#allocation11 + $0x1], 0  ;;  %s2537_s21 = smov 0   ;;  %s2539_s22 = smov 0  }
  0x11   :  { %s2541_s23 = smov 0   ;;  %s2543_s24 = smov 0  }
  0x12   :  { %s2545_s25 = smov 0   ;;  %s2547_s26 = smov 0  }
  0x13 LB: > { %3148 = sst [smem:[#allocation17_spill]] %s2443_s21  ;;  %s3127_s27 = sadd.s32 4294967295, %s2463_s26   ;;  %s2463_s26 = sphi %s2547_s26, %s35_s26   ;;  %s2459_s25 = sphi %s2545_s25, %s3178_s25   ;;  %s2455_s24 = sphi %s2543_s24, %s3177_s24   ;;  %s2451_s23 = sphi %s2541_s23, %s3176_s23   ;;  %s2447_s22 = sphi %s2539_s22, %s3175_s22   ;;  %s2443_s21 = sphi %s2537_s21, %s3174_s21  }
  0x14   : > { %3149 = sst [smem:[#allocation18_spill]] %s2447_s22  ;;  %s3126_s28 = sadd.s32 4294967294, %s2463_s26  }
  0x15   : > { %3150 = sst [smem:[#allocation19_spill]] %s2451_s23  ;;  %s47_s29 = sadd.s32 1, %s2459_s25 }
  0x16   : > { %3151 = sst [smem:[#allocation20_spill]] %s2459_s25  ;;  %s189_s30 = sadd.s32 1, %s2451_s23 }
  0x17   : > { %p49_p0 = scmp.ge.s32.totalorder %s47_s29, 2  ;;  %p199_p1 = scmp.ne.s32.totalorder %s2451_s23, %s2447_s22 }
  0x18   : > { %p200_p2 = scmp.eq.s32.totalorder %s3127_s27, 1  ;;  %p205_p3 = scmp.ne.s32.totalorder %s2447_s22, %s2443_s21 }
  0x19   : > { %s3180_s29 = smov (%p49_p0, %s47_s29), 0  ;;  %p206_p5 = scmp.eq.s32.totalorder %s3126_s28, 1 }
  0x1a   : > { %3152 = sst [smem:[#allocation21_spill]] %s3180_s29  ;;  %p2579_p4 = por %p200_p2, %p199_p1 }
  0x1b   : > { %s184_s14 = ssub.s32 %s2459_s25, %s3180_s29  ;;  %p1922_p6 = scmp.ge.s32.totalorder %s2463_s26, 1 }
  0x1c   : > { %p187_p7 = scmp.eq.s32.totalorder %s184_s14, 0  ;;  %p2588_p8 = por %p206_p5, %p205_p3 }
  0x1d   : > { %p418_p9 = scmp.lt.s32.totalorder %s2463_s26, 3 }
  0x1e   : > { %s3154_s15 = scalar_select %p2588_p8, 1, 0 }
  0x1f   : > { %s2594_s16 = scalar_select %p187_p7, %s2451_s23, %s189_s30  }
  0x20   : > { %3155 = sst [smem:[#allocation22_spill]] %s3154_s15  ;;  %p419_p10 = pnand %p1922_p6, %p418_p9 }
  0x21   : > { %3156 = sst [smem:[#allocation23_spill]] %s2594_s16 }
  0x22   : > { %422 = sbr.rel (%p419_p10) target bundleno = 1102 (0x44e), region = 44 }
  0x27   : > { %s3157_s4 = sld [smem:[#allocation29_spill]]  ;;  %p493_p11 = scmp.lt.s32.totalorder %s2455_s24, 1  ;;  %v2465_v1 = vmov 0   ;;  %vm515_vm0 = vcmask 261120   ;;  %v676_v20 = vlaneseq  ;;  %vm532_vm1 = vcmask 517120  }
  0x28   : > { %2178 = vset.pattern.permute.xlu0 %v2465_v1  ;;  %2179 = vset.pattern.permute.xlu2 %v2465_v1  ;;  %s3158_s0 = sld [smem:[#allocation25_spill]]  ;;  %s3128_s18 = smov 114   ;;  %vm572_vm3 = vcmask 1040384   ;;  %vm565_vm4 = vcmask 15360   ;;  %vm742_vm5 = vcmask 519168   ;;  %vm744_vm6 = vcmask 523268  }
  0x29   : > { %s494_s19 = scalar_select %p493_p11, %s2455_s24, 1  ;;  %2180 = vset.pattern.permute.xlu1 %v2465_v1  ;;  %v677_v24 = vshrl.u32 %v676_v20, 7  ;;  %vm801_vm7 = vcmask 1041408   ;;  %vm794_vm8 = vcmask 31744   ;;  %vm968_vm9 = vcmask 1043456  }
  0x2a   : > { %s3159_s1 = sld [smem:[#allocation26_spill]]  ;;  %s2469_s17 = smov 122   ;;  %vm961_vm10 = vcmask 64512   ;;  %vm1108_vm11 = vcmask 1044480   ;;  %vm1470_vm12 = vcmask 523264  }
  0x2b   : > { %s2065_s20 = sshll.u32 %s494_s19, 5  ;;  %s3160_s2 = sld [smem:[#allocation27_spill]]  ;;  %v678_v29 = vcvt.s32.f32 %v677_v24 }
  0x2c   : > { %s3129_s19 = smov 110   ;;  %s3161_s5 = sld [smem:[#allocation30_spill]] }
  0x2d   : > { %v509_v0 = vld [vmem:[%s3157_s4] sm:$0x3]  ;;  %v707_v6 = vld [vmem:[%s3157_s4 + $0x2] sm:$0xff]  ;;  %v1089_v10 = vld [vmem:[%s3157_s4 + $0x16] sm:$0xf]  ;;  %s3162_s25 = smov 114  }
  0x2e   : > { %512 = vperm.xlu0 %2178, %v509_v0   ;;  %s500_s30 = scalar_lea.vmem %s3158_s0, %s2065_s20  ;;  %v1479_v19 = vld [vmem:[%s3157_s4 + $0x1a] sm:$0xff]  ;;  %s2662_s0 = sand.u32 1, %s2447_s22   ;;  %v708_v53 = vld [vmem:[%s3157_s4 + $0xa] sm:$0xf]  ;;  %v1088_v60 = vld [vmem:[%s3157_s4 + $0xe] sm:$0xff] }
  0x2f   : > { %v2604_v2 = vld [vmem:[%s500_s30 + $0x10] sm:$0xff]  ;;  %v2606_v3 = vld [vmem:[%s500_s30 + $0x18] sm:$0xff]  ;;  %v2608_v4 = vld [vmem:[%s500_s30] sm:$0xff]  ;;  %716 = vperm.xlu2 %2179, %v708_v53   ;;  %s3163_s28 = smov 110   ;;  %s3132_s20 = sshll.u32 %s2662_s0, 2 }
  0x30   : > { %v507_v5 = vpack.c.bf16 %v2606_v3, %v2604_v2  ;;  %v2615_v7 = vld [vmem:[%s500_s30 + $0x8] sm:$0xff]  ;;  %v508_v9 = vld [vmem:[%s3159_s1] sm:$0x1]  ;;  %v1955_v42 = vld [vmem:[%s3159_s1] sm:$0xe]  ;;  %s2724_s14 = sshll.u32 %s2662_s0, 3 }
  0x31   : > { %v506_v8 = vpack.c.bf16 %v2615_v7, %v2608_v4  ;;  %v2629_v11 = vld [vmem:[%s3160_s2] sm:$0xff]  ;;  %v2636_v12 = vld [vmem:[%s3160_s2 + $0x8] sm:$0xff]  ;;  %3164 = sst [smem:[#allocation24_spill]] %s2724_s14  ;;  %s2733_s30 = scalar_lea.vmem [#allocation9], %s2724_s14 }
  0x32   : > { %525 = vmatpush.bf16.msra.mxu0 %v507_v5  ;;  %v1004_v13 = vld [vmem:[%s3161_s5 + $0x50] sm:$0xff]  ;;  %v1221_v14 = vld [vmem:[%s3161_s5 + $0x78] sm:$0xff]  ;;  %v836_v16 = vld [vmem:[%s3161_s5 + $0x28] sm:$0xff]  ;;  %s3165_s3 = sld [smem:[#allocation28_spill]]  ;;  %s3166_s27 = sshll.u32 %s2662_s0, 2 }
  0x33   : > { %v607_v15 = vld [vmem:[%s3161_s5 + $0x10] sm:$0xff]  ;;  %v1218_v17 = vld [vmem:[%s3161_s5 + $0x60] sm:$0xff]  ;;  %v1384_v18 = vld [vmem:[%s3161_s5 + $0x88] sm:$0xff] }
  0x34   : > { %v2070_v43 = vld [vmem:[%s3159_s1] sm:$0x70]  ;;  %v2072_v59 = vld [vmem:[%s3160_s2 + $0x8] sm:$0xff] }
  0x35   : > { %v1956_v47 = vor.u32 %v2070_v43, %v1955_v42  ;;  %v2071_v54 = vld [vmem:[%s3160_s2] sm:$0xff]  ;;  %v2067_v63 = vld [vmem:[%s3160_s2 + $0x8] sm:$0xff] }
  0x36   : > { %711 = vperm.xlu0 %2178, %v707_v6   ;;  %526 = vmatpush.bf16.msra.mxu0 %v506_v8  ;;  %v2066_v62 = vld [vmem:[%s3160_s2] sm:$0xff] }
  0x37   : > { %v724_v51 = vrot.slane %v1956_v47, 1  ;;  %1092 = vperm.xlu2 %2179, %v1088_v60  }
  0x39   : > { %1932 = vmatmul.msk.bf16.vlgmr.msra.gmra.mxu0 %vm515_vm0, %v508_v9 }
  0x3e   : > { %1097 = vperm.xlu0 %2178, %v1089_v10   ;;  %v838_v10 = vld [vmem:[%s3161_s5 + $0x38] sm:$0xff] }
  0x3f   : > { %957 = vrot.lane.b32.xlu2 %v2072_v59, %s2469_s17 }
  0x46   : > { %1175 = vrot.lane.b32.xlu0 %v2629_v11, %s3128_s18  ;;  %s1924_s18 = sshll.u32 %s2662_s0, 1 }
  0x47   : > { %s2665_s29 = scalar_lea.vmem [#allocation4], %s1924_s18  ;;  %1177 = vrot.lane.b32.xlu2 %v2636_v12, %s3162_s25  ;;  %s1923_s18 = sshll.u32 %s2662_s0, 5 }
  0x48   : > { %s1570_s22 = sshll.u32 %s2665_s29, 4  ;;  %s1571_s22 = int_to_ptr.vmem [resolvable:$true] %s1570_s22 }
  0x4e   : > { %1340 = vrot.lane.b32.xlu0 %v2636_v12, %s3129_s19  ;;  %s2468_s19 = smov 126  }
  0x4f   : > { %790 = vrot.lane.b32.xlu1 %v2071_v54, %s2468_s19  ;;  %856 = vperm.xlu2 %2179, %v838_v10  }
  0x56   : > { %1018 = vperm.xlu0 %2178, %v1004_v13  }
  0x57   : > { %792 = vrot.lane.b32.xlu1 %v2072_v59, %s2468_s19  ;;  %s2728_s19 = scalar_lea.vmem [#allocation6], %s3132_s20  ;;  %s2836_s20 = scalar_lea.vmem [#allocation7], %s3166_s27 }
  0x58   : > { %s2930_s27 = scalar_lea.vmem [#allocation2], %s1923_s18  ;;  %s2057_s18 = sshll.u32 %s2455_s24, 1 }
  0x59   : > { %s1568_s25 = scalar_lea.hbm %s3120_s7, %s2057_s18 }
  0x5a   : > { %s1572_s15 = sshll.u32 %s1568_s25, 4  ;;  %s1573_s15 = int_to_ptr.hbm [resolvable:$true] %s1572_s15 }
  0x5e   : > { %1239 = vperm.xlu0 %2178, %v1221_v14  }
  0x5f   : > { %955 = vrot.lane.b32.xlu1 %v2071_v54, %s2469_s17  ;;  %s3167_s17 = sadd.s32 4294967295, %s2463_s26  }
  0x66   : > { %621 = vperm.xlu0 %2178, %v607_v15  }
  0x67   : > { %1338 = vrot.lane.b32.xlu1 %v2629_v11, %s3163_s28  ;;  %s2826_s28 = scalar_lea.vmem [#allocation10], %s2724_s14 }
  0x6e   : > { %846 = vperm.xlu0 %2178, %v836_v16  }
  0x76   : > { %1224 = vperm.xlu0 %2178, %v1218_v17  }
  0x7e   : > { %1394 = vperm.xlu0 %2178, %v1384_v18  }
  0x86   : > { %1482 = vperm.xlu0 %2178, %v1479_v19  }
  0x89   : > { %v717_v9 = vpop.permute.xlu2 %716 }
  0xa0   : > { %v513_v21 = vpop.permute.xlu0 %512 }
  0xa8   : > { %v712_v0 = vpop.permute.xlu0 %711 }
  0xb6   : > { %v528_v22 = vpop.f32.mrf.mxu0 }
  0xb7   : > { %v529_v23 = vadd.f32 %v528_v22, %v513_v21 }
  0xb9   : > { %v534_v25 = vmul.f32 0.5, %v529_v23  ;;  %v680_v26 = vrot.slane %v529_v23, 1  ;;  %533 = vst.msk [vmem:[%s2665_s29] sm:$0x3] %vm532_vm1, %v529_v23  ;;  %s2225_s29 = scalar_lea.hbm %s3120_s7, 4 }
  0xbb   : > { %v536_v27 = vrot.slane %v534_v25, 1  ;;  %v682_v28 = vmax.f32 %v529_v23, %v680_v26 }
  0xbd   : > { %v538_v30 = vmax.f32 %v534_v25, %v536_v27  ;;  %v683_v31 = vperm.slane %v682_v28, 0 }
  0xbe   : > { %v530_v32 = vpop.f32.mrf.mxu0 }
  0xbf   : > { %v539_v33 = vperm.slane %v538_v30, 0  ;;  %vm684_vm2 = vcmp.eq.f32.partialorder %v529_v23, %v683_v31 }
  0xc0   : > { %v685_v34 = vsel %vm684_vm2, %v678_v29, 2.0  ;;  %v1220_v29 = vld [vmem:[%s3161_s5 + $0x70] sm:$0xff] }
  0xc1   : > { %v540_v35 = vsub.f32 %v534_v25, %v539_v33  ;;  %v687_v36 = vrot.slane %v685_v34, 1  ;;  %1234 = vperm.xlu2 %2179, %v1220_v29  }
  0xc3   : > { %v541_v37 = vmul.f32 1.442695, %v540_v35  ;;  %v2668_v38 = vmin.f32 %v685_v34, %v687_v36  ;;  %v1386_v34 = vld [vmem:[%s3161_s5 + $0x98] sm:$0xff] }
  0xc5   : > { %v2671_v39 = vperm.slane %v2668_v38, 0  ;;  %2181 = vpow2.f32 %v541_v37  ;;  %v690_v60 = vsub.f32 1.0, %v2668_v38  ;;  %v2068_v38 = vld [vmem:[%s3165_s3] sm:$0xff] }
  0xc7   : > { %v2675_v40 = vmul.f32 %v2671_v39, %v2604_v2  ;;  %v2679_v41 = vmul.f32 %v2671_v39, %v2606_v3  ;;  %v2691_v45 = vmul.f32 %v2671_v39, %v2608_v4  ;;  %v2695_v46 = vmul.f32 %v2671_v39, %v2615_v7 }
  0xc9   : > { %v702_v44 = vpack.c.bf16 %v2679_v41, %v2675_v40  ;;  %v701_v50 = vpack.c.bf16 %v2695_v46, %v2691_v45  ;;  %1404 = vperm.xlu2 %2179, %v1386_v34   ;;  %v2069_v34 = vld [vmem:[%s3165_s3 + $0x8] sm:$0xff] }
  0xcb   : > { %v2182_v48 = vpop.eup %2181  ;;  %734 = vmatpush.bf16.msra.mxu3 %v702_v44 }
  0xcc   : > { %v544_v49 = vrot.slane %v2182_v48, 1 }
  0xce   : > { %v546_v52 = vadd.f32 %v2182_v48, %v544_v49 }
  0xcf   : > { %735 = vmatpush.bf16.msra.mxu3 %v701_v50 }
  0xd0   : > { %2183 = vrcp.f32 %v546_v52  ;;  %v835_v52 = vld [vmem:[%s3161_s5 + $0x20] sm:$0xff] }
  0xd1   : > { %841 = vperm.xlu2 %2179, %v835_v52   ;;  %v2000_v52 = vld [vmem:[%s3159_s1 + $0x4] sm:$0x8] }
  0xd2   : > { %1957 = vmatmul.msk.bf16.vlgmr.msra.gmra.mxu3 %vm515_vm0, %v724_v51 }
  0xd6   : > { %v2184_v55 = vpop.eup %2183 }
  0xd7   : > { %v548_v56 = vperm.slane %v2184_v55, 0 }
  0xd9   : > { %v549_v57 = vmul.f32 %v2182_v48, %v548_v56 }
  0xdb   : > { %v554_v58 = vpack.c.bf16 %v549_v57, %v549_v57 }
  0xdd   : > { %v574_v61 = vsel %vm572_vm3, %v554_v58, 0 }
  0xde   : > { %583 = vmatpush.bf16.msra.mxu1 %v574_v61 }
  0xe1   : > { %1941 = vmatmul.msk.bf16.vlgmr.msra.gmra.mxu1 %vm565_vm4, %v2066_v62 }
  0xf1   : > { %1942 = vmatmul.msk.bf16.gmra.mxu1 %vm565_vm4, %v2067_v63 }
 0x155   : > { %v737_v1 = vpop.f32.mrf.mxu3 }
 0x156   : > { %v738_v5 = vadd.f32 %v737_v1, %v712_v0 }
 0x158   : > { %743 = vst.msk [vmem:[%s2728_s19] sm:$0xf] %vm742_vm5, %v738_v5  ;;  %v747_v6 = vmul.f32 0.5, %v738_v5 }
 0x159   : > { %745 = vst.msk [vmem:[%s2733_s30 - $0x4] sm:$0xf0] %vm744_vm6, %v738_v5 }
 0x15a   : > { %v749_v8 = vrot.slane %v747_v6, 1  ;;  %v752_v12 = vrot.slane %v747_v6, 2  ;;  %v755_v16 = vrot.slane %v747_v6, 3 }
 0x15c   : > { %v751_v11 = vmax.f32 %v747_v6, %v749_v8  ;;  %v1003_v8 = vld [vmem:[%s3161_s5 + $0x48] sm:$0xff] }
 0x15d   : > { %v739_v13 = vpop.f32.mrf.mxu3  ;;  %1013 = vperm.xlu2 %2179, %v1003_v8  }
 0x15e   : > { %v740_v14 = vadd.f32 %v739_v13, %v717_v9  ;;  %v754_v15 = vmax.f32 %v751_v11, %v752_v12  ;;  %v585_v17 = vpop.f32.mrf.mxu1 }
 0x15f   : > { %v595_v56 = vmax.f32 %v585_v17, 0.0 }
 0x160   : > { %746 = vst.msk [vmem:[%s2733_s30 + $0x4] sm:$0xf] %vm742_vm5, %v740_v14  ;;  %v757_v18 = vmax.f32 %v754_v15, %v755_v16  ;;  %v906_v19 = vmul.f32 0.5, %v740_v14 }
 0x162   : > { %v758_v20 = vperm.slane %v757_v18, 0  ;;  %v908_v21 = vrot.slane %v906_v19, 4  ;;  %v911_v24 = vrot.slane %v906_v19, 5  ;;  %v914_v27 = vrot.slane %v906_v19, 6 }
 0x163   : > { %v917_v31 = vrot.slane %v906_v19, 7 }
 0x164   : > { %v759_v22 = vsub.f32 %v747_v6, %v758_v20  ;;  %v910_v23 = vmax.f32 %v757_v18, %v908_v21 }
 0x166   : > { %v760_v25 = vmul.f32 1.442695, %v759_v22  ;;  %v913_v26 = vmax.f32 %v910_v23, %v911_v24  ;;  %v587_v28 = vpop.f32.mrf.mxu1 }
 0x167   : > { %v596_v57 = vmax.f32 %v587_v28, 0.0  ;;  %v791_v28 = vpop.permute.xlu1 %790 }
 0x168   : > { %2185 = vpow2.f32 %v760_v25  ;;  %v916_v30 = vmax.f32 %v913_v26, %v914_v27  ;;  %v1383_v27 = vld [vmem:[%s3161_s5 + $0x80] sm:$0xff] }
 0x169   : > { %v603_v63 = vpack.c.bf16 %v596_v57, %v595_v56  ;;  %1389 = vperm.xlu2 %2179, %v1383_v27   ;;  %v1093_v56 = vpop.permute.xlu2 %1092 }
 0x16a   : > { %v919_v32 = vmax.f32 %v916_v30, %v917_v31 }
 0x16c   : > { %v920_v33 = vperm.slane %v919_v32, 4 }
 0x16e   : > { %v2186_v35 = vpop.eup %2185  ;;  %v921_v36 = vsub.f32 %v747_v6, %v920_v33  ;;  %v922_v37 = vsub.f32 %v906_v19, %v920_v33  ;;  %v590_v42 = vpop.f32.mrf.mxu1  ;;  %v2752_v6 = vperm.slane %v690_v60, 0  ;;  %v606_v33 = vld [vmem:[%s3161_s5 + $0x8] sm:$0xff] }
 0x16f   : > { %v763_v43 = vrot.slane %v2186_v35, 1  ;;  %v766_v48 = vrot.slane %v2186_v35, 2  ;;  %v769_v51 = vrot.slane %v2186_v35, 3  ;;  %v597_v53 = vmax.f32 %v590_v42, 0.0 }
 0x170   : > { %v923_v44 = vmul.f32 1.442695, %v921_v36  ;;  %v925_v49 = vmul.f32 1.442695, %v922_v37  ;;  %v2762_v16 = vmul.f32 %v2752_v6, %v2604_v2  ;;  %v2766_v17 = vmul.f32 %v2752_v6, %v2606_v3  ;;  %v793_v36 = vpop.permute.xlu1 %792 }
 0x171   : > { %v765_v47 = vadd.f32 %v2186_v35, %v763_v43  ;;  %v2774_v25 = vmul.f32 %v2752_v6, %v2608_v4  ;;  %v2778_v26 = vmul.f32 %v2752_v6, %v2615_v7  ;;  %616 = vperm.xlu2 %2179, %v606_v33   ;;  %v958_v60 = vpop.permute.xlu2 %957 }
 0x172   : > { %2187 = vpow2.f32 %v923_v44  ;;  %v704_v24 = vpack.c.bf16 %v2766_v17, %v2762_v16 }
 0x173   : > { %v768_v50 = vadd.f32 %v766_v48, %v765_v47  ;;  %2189 = vpow2.f32 %v925_v49  ;;  %v703_v32 = vpack.c.bf16 %v2778_v26, %v2774_v25  ;;  %v1087_v48 = vld [vmem:[%s3159_s1 + $0xc] sm:$0x1] }
 0x175   : > { %v771_v54 = vadd.f32 %v769_v51, %v768_v50  ;;  %v1105_v51 = vunpack.c.l.b16 %v1087_v48 }
 0x176   : > { %v592_v55 = vpop.f32.mrf.mxu1 }
 0x177   : > { %v598_v58 = vmax.f32 %v592_v55, 0.0  ;;  %2191 = vrcp.f32 %v771_v54  ;;  %v1107_v55 = vpack.c.b16 %v1105_v51, %v1105_v51 }
 0x178   : > { %v2188_v59 = vpop.eup %2187  ;;  %v956_v50 = vpop.permute.xlu1 %955 }
 0x179   : > { %v604_v61 = vpack.c.bf16 %v598_v58, %v597_v53  ;;  %v928_v62 = vrot.slane %v2188_v59, 1  ;;  %v931_v1 = vrot.slane %v2188_v59, 2  ;;  %v2190_v5 = vpop.eup %2189  ;;  %v934_v11 = vrot.slane %v2188_v59, 3  ;;  %v2077_v53 = vld [vmem:[%s3159_s1 + $0x4] sm:$0xf0] }
 0x17a   : > { %v938_v14 = vrot.slane %v2190_v5, 4  ;;  %v941_v19 = vrot.slane %v2190_v5, 5  ;;  %v944_v22 = vrot.slane %v2190_v5, 6  ;;  %v947_v30 = vrot.slane %v2190_v5, 7 }
 0x17b   : > { %651 = vmatpush.bf16.msra.mxu2 %v604_v61  ;;  %v930_v0 = vadd.f32 %v2188_v59, %v928_v62  ;;  %v2001_v54 = vor.u32 %v2077_v53, %v2000_v52  ;;  %v1110_v58 = vrot.slane %v1107_v55, 3  ;;  %v837_v61 = vld [vmem:[%s3161_s5 + $0x30] sm:$0xff] }
 0x17c   : > { %851 = vperm.xlu1 %2180, %v837_v61  }
 0x17d   : > { %v2192_v9 = vpop.eup %2191  ;;  %v933_v10 = vadd.f32 %v931_v1, %v930_v0  ;;  %v1109_v57 = vrot.slane %v2001_v54, 3  ;;  %v1385_v1 = vld [vmem:[%s3161_s5 + $0x90] sm:$0xff] }
 0x17e   : > { %v773_v12 = vperm.slane %v2192_v9, 0  ;;  %v608_v9 = vld [vmem:[%s3161_s5 + $0x18] sm:$0xff] }
 0x17f   : > { %652 = vmatpush.bf16.msra.mxu2 %v603_v63  ;;  %v936_v13 = vadd.f32 %v934_v11, %v933_v10  ;;  %v1005_v63 = vld [vmem:[%s3161_s5 + $0x58] sm:$0xff] }
 0x180   : > { %v774_v15 = vmul.f32 %v2186_v35, %v773_v12 }
 0x181   : > { %v940_v18 = vadd.f32 %v938_v14, %v936_v13 }
 0x182   : > { %1951 = vmatmul.msk.bf16.vlgmr.msra.gmra.mxu2 %vm515_vm0, %v2068_v38  ;;  %v779_v20 = vpack.c.bf16 %v774_v15, %v774_v15 }
 0x183   : > { %v943_v21 = vadd.f32 %v941_v19, %v940_v18  ;;  %v1002_v18 = vld [vmem:[%s3161_s5 + $0x40] sm:$0xff] }
 0x184   : > { %v803_v23 = vsel %vm801_vm7, %v779_v20, 0  ;;  %1023 = vperm.xlu1 %2180, %v1005_v63  }
 0x185   : > { %812 = vmatpush.bf16.msrb.mxu0 %v803_v23  ;;  %v946_v29 = vadd.f32 %v944_v22, %v943_v21  ;;  %v2073_v21 = vld [vmem:[%s3165_s3 + $0x10] sm:$0xff] }
 0x187   : > { %v949_v31 = vadd.f32 %v947_v30, %v946_v29 }
 0x188   : > { %1966 = vmatmul.msk.bf16.vlgmr.msrb.gmra.mxu0 %vm794_vm8, %v791_v28 }
 0x189   : > { %1121 = vmatpush.bf16.msra.mxu0 %v704_v24  ;;  %2193 = vrcp.f32 %v949_v31  ;;  %v1219_v24 = vld [vmem:[%s3161_s5 + $0x68] sm:$0xff]  ;;  %v1098_v31 = vpop.permute.xlu0 %1097 }
 0x18c   : > { %1399 = vperm.xlu1 %2180, %v1385_v1  }
 0x18d   : > { %1122 = vmatpush.bf16.msra.mxu0 %v703_v32 }
 0x18f   : > { %v2194_v35 = vpop.eup %2193 }
 0x190   : > { %v951_v37 = vperm.slane %v2194_v35, 4 }
 0x192   : > { %1952 = vmatmul.msk.bf16.gmra.mxu2 %vm515_vm0, %v2069_v34  ;;  %v952_v42 = vmul.f32 %v2188_v59, %v951_v37  ;;  %v953_v43 = vmul.f32 %v2190_v5, %v951_v37  ;;  %v1111_v59 = vsel %vm1108_vm11, %v1109_v57, %v1110_v58 }
 0x194   : > { %v954_v44 = vpack.c.bf16 %v953_v43, %v952_v42  ;;  %626 = vperm.xlu1 %2180, %v608_v9   ;;  %v605_v42 = vld [vmem:[%s3161_s5] sm:$0xff]  ;;  %s2219_s5 = sshra.s32 %s1573_s15, 4  ;;  %s2220_s5 = int_to_ptr.hbm [resolvable:$true] %s2219_s5 }
 0x195   : > { %s2221_s16 = scalar_lea.hbm %s2220_s5, 2  ;;  %p2226_p1 = scmp.lt.s32.totalorder %s2220_s5, %s3120_s7 }
 0x196   : > { %v960_v47 = vrot.slane %v954_v44, 2  ;;  %p2222_p12 = scmp.ne.s32.totalorder %s2220_s5, %s2221_s16  ;;  %p2227_p2 = scmp.lt.s32.totalorder %s2225_s29, %s2221_s16 }
 0x198   : > { %1967 = vmatmul.msk.bf16.gmra.mxu0 %vm794_vm8, %v793_v36  ;;  %v970_v49 = vsel %vm968_vm9, %v960_v47, 0  ;;  %p2223_p13 = pnand %p2222_p12, %p2579_p4  ;;  %p2228_p3 = por %p2227_p2, %p2226_p1 }
 0x199   : > { %979 = vmatpush.bf16.msrb.mxu1 %v970_v49 }
 0x19a   : > { %p2224_p0 = pneg %p2223_p13 }
 0x19c   : > { %1982 = vmatmul.msk.bf16.vlgmr.msrb.gmra.mxu1 %vm961_vm10, %v956_v50  ;;  %1008 = vperm.xlu1 %2180, %v1002_v18   ;;  %p2229_p5 = pnand %p2228_p3, %p2224_p0 }
 0x1a4   : > { %1229 = vperm.xlu1 %2180, %v1219_v24  }
 0x1a8   : > { %2002 = vmatmul.msk.bf16.vlgmr.msra.gmra.mxu0 %vm515_vm0, %v1111_v59 }
 0x1ac   : > { %1983 = vmatmul.msk.bf16.gmra.mxu1 %vm961_vm10, %v958_v60  ;;  %611 = vperm.xlu1 %2180, %v605_v42  }
 0x205   : > { %v814_v62 = vpop.f32.mrf.mxu0 }
 0x206   : > { %v824_v15 = vmax.f32 %v814_v62, 0.0 }
 0x20d   : > { %v816_v0 = vpop.f32.mrf.mxu0 }
 0x20e   : > { %v825_v12 = vmax.f32 %v816_v0, 0.0  ;;  %v2075_v0 = vld [vmem:[%s3165_s3 + $0x20] sm:$0xff] }
 0x210   : > { %v833_v19 = vpack.c.bf16 %v825_v12, %v824_v15 }
 0x215   : > { %v819_v5 = vpop.f32.mrf.mxu0 }
 0x216   : > { %v826_v11 = vmax.f32 %v819_v5, 0.0 }
 0x219   : > { %v981_v8 = vpop.f32.mrf.mxu1 }
 0x21a   : > { %v991_v49 = vmax.f32 %v981_v8, 0.0 }
 0x21d   : > { %v821_v10 = vpop.f32.mrf.mxu0 }
 0x21e   : > { %v827_v38 = vmax.f32 %v821_v10, 0.0 }
 0x220   : > { %v834_v13 = vpack.c.bf16 %v827_v38, %v826_v11 }
 0x221   : > { %v983_v14 = vpop.f32.mrf.mxu1 }
 0x222   : > { %881 = vmatpush.bf16.msrb.mxu3 %v834_v13  ;;  %v992_v50 = vmax.f32 %v983_v14, 0.0 }
 0x224   : > { %v1000_v60 = vpack.c.bf16 %v992_v50, %v991_v49 }
 0x225   : > { %v1124_v20 = vpop.f32.mrf.mxu0 }
 0x226   : > { %v1125_v22 = vadd.f32 %v1124_v20, %v1093_v56  ;;  %882 = vmatpush.bf16.msrb.mxu3 %v833_v19  ;;  %v2074_v56 = vld [vmem:[%s3165_s3 + $0x18] sm:$0xff] }
 0x228   : > { %1130 = vst.msk [vmem:[%s2826_s28 - $0x4] sm:$0xf0] %vm744_vm6, %v1125_v22  ;;  %v1132_v23 = vmul.f32 0.5, %v1125_v22 }
 0x229   : > { %1980 = vmatmul.msk.bf16.vlgmr.msrb.gmra.mxu3 %vm515_vm0, %v2073_v21  ;;  %v986_v27 = vpop.f32.mrf.mxu1  ;;  %1129 = vst.msk [vmem:[%s2836_s20] sm:$0xf] %vm742_vm5, %v1125_v22  ;;  %v2076_v21 = vld [vmem:[%s3165_s3 + $0x28] sm:$0xff] }
 0x22a   : > { %v1134_v28 = vrot.slane %v1132_v23, 1  ;;  %v1137_v30 = vrot.slane %v1132_v23, 2  ;;  %v1140_v35 = vrot.slane %v1132_v23, 3  ;;  %v993_v43 = vmax.f32 %v986_v27, 0.0 }
 0x22c   : > { %v1136_v29 = vmax.f32 %v1132_v23, %v1134_v28 }
 0x22d   : > { %v1126_v32 = vpop.f32.mrf.mxu0 }
 0x22e   : > { %v1127_v33 = vadd.f32 %v1126_v32, %v1098_v31  ;;  %v1139_v34 = vmax.f32 %v1136_v29, %v1137_v30 }
 0x230   : > { %1131 = vst.msk [vmem:[%s2826_s28 + $0x4] sm:$0xf] %vm742_vm5, %v1127_v33  ;;  %v1142_v36 = vmax.f32 %v1139_v34, %v1140_v35  ;;  %v1289_v37 = vmul.f32 0.5, %v1127_v33 }
 0x231   : > { %v988_v44 = vpop.f32.mrf.mxu1 }
 0x232   : > { %v1143_v47 = vperm.slane %v1142_v36, 0  ;;  %v1291_v48 = vrot.slane %v1289_v37, 4  ;;  %v994_v51 = vmax.f32 %v988_v44, 0.0  ;;  %v1294_v54 = vrot.slane %v1289_v37, 5 }
 0x233   : > { %v1297_v59 = vrot.slane %v1289_v37, 6  ;;  %v1300_v62 = vrot.slane %v1289_v37, 7 }
 0x234   : > { %v1144_v52 = vsub.f32 %v1132_v23, %v1143_v47  ;;  %v1293_v53 = vmax.f32 %v1142_v36, %v1291_v48  ;;  %v1001_v55 = vpack.c.bf16 %v994_v51, %v993_v43  ;;  %v1176_v48 = vpop.permute.xlu0 %1175 }
 0x236   : > { %v1145_v57 = vmul.f32 1.442695, %v1144_v52  ;;  %v1296_v58 = vmax.f32 %v1293_v53, %v1294_v54  ;;  %1048 = vmatpush.bf16.msrb.mxu2 %v1001_v55 }
 0x238   : > { %2195 = vpow2.f32 %v1145_v57  ;;  %v1299_v61 = vmax.f32 %v1296_v58, %v1297_v59  ;;  %v1339_v58 = vpop.permute.xlu1 %1338 }
 0x239   : > { %1981 = vmatmul.msk.bf16.gmra.mxu3 %vm515_vm0, %v2074_v56  ;;  %v1178_v56 = vpop.permute.xlu2 %1177 }
 0x23a   : > { %v1302_v63 = vmax.f32 %v1299_v61, %v1300_v62  ;;  %1049 = vmatpush.bf16.msrb.mxu2 %v1000_v60 }
 0x23c   : > { %v1303_v1 = vperm.slane %v1302_v63, 4  ;;  %v1341_v59 = vpop.permute.xlu0 %1340 }
 0x23d   : > { %1996 = vmatmul.msk.bf16.vlgmr.msrb.gmra.mxu2 %vm515_vm0, %v2075_v0 }
 0x23e   : > { %v2196_v5 = vpop.eup %2195  ;;  %v1304_v8 = vsub.f32 %v1132_v23, %v1303_v1  ;;  %v1305_v9 = vsub.f32 %v1289_v37, %v1303_v1  ;;  %v654_v1 = vpop.f32.mrf.mxu2 }
 0x23f   : > { %v1148_v10 = vrot.slane %v2196_v5, 1  ;;  %v1151_v12 = vrot.slane %v2196_v5, 2  ;;  %v1154_v15 = vrot.slane %v2196_v5, 3 }
 0x240   : > { %v1306_v11 = vmul.f32 1.442695, %v1304_v8  ;;  %v1308_v13 = vmul.f32 1.442695, %v1305_v9  ;;  %v852_v60 = vpop.permute.xlu1 %851 }
 0x241   : > { %v1150_v38 = vadd.f32 %v2196_v5, %v1148_v10  ;;  %v857_v61 = vpop.permute.xlu2 %856 }
 0x242   : > { %2197 = vpow2.f32 %v1306_v11 }
 0x243   : > { %v1153_v14 = vadd.f32 %v1151_v12, %v1150_v38  ;;  %2199 = vpow2.f32 %v1308_v13 }
 0x244   : > { %v1019_v9 = vpop.permute.xlu0 %1018 }
 0x245   : > { %v1156_v18 = vadd.f32 %v1154_v15, %v1153_v14 }
 0x246   : > { %v656_v10 = vpop.f32.mrf.mxu2 }
 0x247   : > { %2201 = vrcp.f32 %v1156_v18 }
 0x248   : > { %v2198_v19 = vpop.eup %2197  ;;  %v2863_v62 = vpop.permute.xlu1 %1023 }
 0x249   : > { %v1311_v20 = vrot.slane %v2198_v19, 1  ;;  %v1314_v23 = vrot.slane %v2198_v19, 2  ;;  %v2200_v24 = vpop.eup %2199  ;;  %v1317_v29 = vrot.slane %v2198_v19, 3  ;;  %v2865_v63 = vpop.permute.xlu2 %1234 }
 0x24a   : > { %v1321_v32 = vrot.slane %v2200_v24, 4  ;;  %v1324_v35 = vrot.slane %v2200_v24, 5  ;;  %v1327_v42 = vrot.slane %v2200_v24, 6  ;;  %v1330_v47 = vrot.slane %v2200_v24, 7 }
 0x24b   : > { %v1313_v22 = vadd.f32 %v2198_v19, %v1311_v20 }
 0x24c   : > { %v2871_v12 = vpop.permute.xlu0 %1239 }
 0x24d   : > { %v2202_v27 = vpop.eup %2201  ;;  %v1316_v28 = vadd.f32 %v1314_v23, %v1313_v22  ;;  %1997 = vmatmul.msk.bf16.gmra.mxu2 %vm515_vm0, %v2076_v21 }
 0x24e   : > { %v1158_v30 = vperm.slane %v2202_v27, 0  ;;  %v659_v13 = vpop.f32.mrf.mxu2 }
 0x24f   : > { %v1319_v31 = vadd.f32 %v1317_v29, %v1316_v28 }
 0x250   : > { %v1159_v33 = vmul.f32 %v2196_v5, %v1158_v30  ;;  %v2867_v0 = vpop.permute.xlu1 %1399 }
 0x251   : > { %v1323_v34 = vadd.f32 %v1321_v32, %v1319_v31  ;;  %v2869_v5 = vpop.permute.xlu2 %1404 }
 0x252   : > { %v1164_v36 = vpack.c.bf16 %v1159_v33, %v1159_v33 }
 0x253   : > { %v1326_v37 = vadd.f32 %v1324_v35, %v1323_v34 }
 0x254   : > { %v1186_v43 = vsel %vm801_vm7, %v1164_v36, 0  ;;  %v622_v20 = vpop.permute.xlu0 %621 }
 0x255   : > { %1195 = vmatpush.bf16.msra.mxu3 %v1186_v43  ;;  %v1329_v44 = vadd.f32 %v1327_v42, %v1326_v37 }
 0x257   : > { %v1332_v49 = vadd.f32 %v1330_v47, %v1329_v44 }
 0x258   : > { %2011 = vmatmul.msk.bf16.vlgmr.msra.gmra.mxu3 %vm794_vm8, %v1176_v48  ;;  %v627_v8 = vpop.permute.xlu1 %626 }
 0x259   : > { %2203 = vrcp.f32 %v1332_v49  ;;  %v842_v11 = vpop.permute.xlu2 %841 }
 0x25c   : > { %v847_v32 = vpop.permute.xlu0 %846 }
 0x25f   : > { %v2204_v50 = vpop.eup %2203 }
 0x260   : > { %v1334_v51 = vperm.slane %v2204_v50, 4  ;;  %v1009_v38 = vpop.permute.xlu1 %1008 }
 0x261   : > { %v1014_v14 = vpop.permute.xlu2 %1013 }
 0x262   : > { %v1335_v52 = vmul.f32 %v2198_v19, %v1334_v51  ;;  %v1336_v53 = vmul.f32 %v2200_v24, %v1334_v51  ;;  %v661_v19 = vpop.f32.mrf.mxu2 }
 0x264   : > { %v1337_v54 = vpack.c.bf16 %v1336_v53, %v1335_v52 }
 0x266   : > { %v1343_v55 = vrot.slane %v1337_v54, 2 }
 0x268   : > { %2012 = vmatmul.msk.bf16.gmra.mxu3 %vm794_vm8, %v1178_v56  ;;  %v1351_v57 = vsel %vm968_vm9, %v1343_v55, 0  ;;  %v2873_v15 = vpop.permute.xlu1 %1229 }
 0x269   : > { %1360 = vmatpush.bf16.msrb.mxu0 %v1351_v57  ;;  %v2875_v21 = vpop.permute.xlu2 %1389 }
 0x26c   : > { %2027 = vmatmul.msk.bf16.vlgmr.msrb.gmra.mxu0 %vm961_vm10, %v1339_v58 }
 0x270   : > { %v612_v22 = vpop.permute.xlu1 %611 }
 0x271   : > { %v655_v27 = vadd.f32 %v654_v1, %v612_v22  ;;  %v617_v33 = vpop.permute.xlu2 %616  ;;  %v660_v1 = vadd.f32 %v659_v13, %v622_v20 }
 0x272   : > { %v657_v43 = vadd.f32 %v656_v10, %v617_v33 }
 0x273   : > { %v664_v31 = vadd.f32 %v655_v27, %v2608_v4 }
 0x274   : > { %v665_v4 = vadd.f32 %v657_v43, %v2615_v7 }
 0x275   : > { %v668_v42 = vmul.f32 0.5, %v664_v31 }
 0x277   : > { %v672_v52 = vmax.f32 %v668_v42, 0.0 }
 0x27c   : > { %2028 = vmatmul.msk.bf16.gmra.mxu0 %vm961_vm10, %v1341_v59  ;;  %v669_v59 = vmul.f32 0.5, %v665_v4 }
 0x27e   : > { %v673_v7 = vmax.f32 %v669_v59, 0.0 }
 0x2ac   : > { %v884_v18 = vpop.f32.mrf.mxu3 }
 0x2ad   : > { %v885_v23 = vadd.f32 %v884_v18, %v842_v11 }
 0x2af   : > { %v894_v28 = vadd.f32 %v885_v23, %v2691_v45 }
 0x2b1   : > { %v898_v34 = vmul.f32 0.5, %v894_v28 }
 0x2b3   : > { %v902_v47 = vmax.f32 %v898_v34, 0.0 }
 0x2b4   : > { %v886_v24 = vpop.f32.mrf.mxu3 }
 0x2b5   : > { %v887_v35 = vadd.f32 %v886_v24, %v847_v32 }
 0x2b7   : > { %v895_v48 = vadd.f32 %v887_v35, %v2695_v46 }
 0x2b9   : > { %v899_v54 = vmul.f32 0.5, %v895_v48 }
 0x2bb   : > { %v903_v10 = vmax.f32 %v899_v54, 0.0 }
 0x2bc   : > { %v889_v44 = vpop.f32.mrf.mxu3 }
 0x2bd   : > { %v890_v55 = vadd.f32 %v889_v44, %v852_v60  ;;  %v666_v60 = vadd.f32 %v660_v1, %v2604_v2  ;;  %v2080_v1 = vld [vmem:[%s3165_s3 + $0x30] sm:$0xff] }
 0x2bf   : > { %v896_v11 = vadd.f32 %v890_v55, %v2675_v40  ;;  %v670_v20 = vmul.f32 0.5, %v666_v60  ;;  %v2083_v60 = vld [vmem:[%s3165_s3 + $0x48] sm:$0xff] }
 0x2c0   : > { %v1051_v29 = vpop.f32.mrf.mxu2 }
 0x2c1   : > { %v1052_v30 = vadd.f32 %v1051_v29, %v1009_v38  ;;  %v900_v24 = vmul.f32 0.5, %v896_v11  ;;  %v662_v29 = vadd.f32 %v661_v19, %v627_v8 }
 0x2c3   : > { %v1061_v36 = vadd.f32 %v1052_v30, %v2691_v45  ;;  %v904_v31 = vmax.f32 %v900_v24, 0.0 }
 0x2c4   : > { %v891_v18 = vpop.f32.mrf.mxu3 }
 0x2c5   : > { %v1065_v37 = vmul.f32 0.5, %v1061_v36  ;;  %v892_v27 = vadd.f32 %v891_v18, %v857_v61  ;;  %v674_v36 = vmax.f32 %v670_v20, 0.0 }
 0x2c7   : > { %v1069_v49 = vmax.f32 %v1065_v37, 0.0  ;;  %v897_v32 = vadd.f32 %v892_v27, %v2679_v41  ;;  %v1225_v27 = vpop.permute.xlu0 %1224 }
 0x2c8   : > { %v1053_v50 = vpop.f32.mrf.mxu2 }
 0x2c9   : > { %v1073_v51 = vadd.f32 %v1069_v49, %v902_v47  ;;  %v1054_v53 = vadd.f32 %v1053_v50, %v1014_v14  ;;  %v901_v37 = vmul.f32 0.5, %v897_v32 }
 0x2cb   : > { %v1077_v56 = vmul.f32 %v1073_v51, %v2671_v39  ;;  %v1062_v45 = vadd.f32 %v1054_v53, %v2695_v46  ;;  %v905_v44 = vmax.f32 %v901_v37, 0.0 }
 0x2cd   : > { %v2884_v57 = vadd.f32 %v1077_v56, %v672_v52  ;;  %v1066_v58 = vmul.f32 0.5, %v1062_v45 }
 0x2cf   : > { %v1070_v38 = vmax.f32 %v1066_v58, 0.0 }
 0x2d0   : > { %v1056_v22 = vpop.f32.mrf.mxu2 }
 0x2d1   : > { %v1074_v14 = vadd.f32 %v1070_v38, %v903_v10  ;;  %v1057_v23 = vadd.f32 %v1056_v22, %v1019_v9  ;;  %v667_v9 = vadd.f32 %v662_v29, %v2606_v3 }
 0x2d3   : > { %v1078_v46 = vmul.f32 %v1074_v14, %v2671_v39  ;;  %v1063_v28 = vadd.f32 %v1057_v23, %v2675_v40  ;;  %v671_v19 = vmul.f32 0.5, %v667_v9  ;;  %v2082_v23 = vld [vmem:[%s3165_s3 + $0x40] sm:$0xff] }
 0x2d5   : > { %v1067_v30 = vmul.f32 0.5, %v1063_v28  ;;  %v2890_v13 = vadd.f32 %v1078_v46, %v673_v7  ;;  %v675_v48 = vmax.f32 %v671_v19, 0.0  ;;  %v2081_v7 = vld [vmem:[%s3165_s3 + $0x38] sm:$0xff]  ;;  %s2058_s3 = sshll.u32 %s2455_s24, 2 }
 0x2d6   : > { %s1598_s4 = scalar_lea.hbm %s3122_s9, %s2058_s3  ;;  %s2974_s14 = scalar_lea.hbm %s3121_s8, %s2058_s3 }
 0x2d7   : > { %v1071_v33 = vmax.f32 %v1067_v30, 0.0 }
 0x2d8   : > { %v1058_v34 = vpop.f32.mrf.mxu2 }
 0x2d9   : > { %v1075_v35 = vadd.f32 %v1071_v33, %v904_v31  ;;  %v1059_v2 = vadd.f32 %v1058_v34, %v2863_v62 }
 0x2db   : > { %v1197_v61 = vpop.f32.mrf.mxu3  ;;  %v1079_v40 = vmul.f32 %v1075_v35, %v2671_v39  ;;  %v1064_v8 = vadd.f32 %v1059_v2, %v2679_v41 }
 0x2dc   : > { %v1207_v41 = vmax.f32 %v1197_v61, 0.0 }
 0x2dd   : > { %v2897_v42 = vadd.f32 %v1079_v40, %v674_v36  ;;  %v1068_v43 = vmul.f32 0.5, %v1064_v8  ;;  %v1395_v36 = vpop.permute.xlu0 %1394 }
 0x2df   : > { %v1072_v47 = vmax.f32 %v1068_v43, 0.0 }
 0x2e1   : > { %v1076_v49 = vadd.f32 %v1072_v47, %v905_v44 }
 0x2e3   : > { %v1199_v50 = vpop.f32.mrf.mxu3  ;;  %v1080_v3 = vmul.f32 %v1076_v49, %v2671_v39 }
 0x2e4   : > { %v1208_v56 = vmax.f32 %v1199_v50, 0.0 }
 0x2e5   : > { %v2900_v51 = vadd.f32 %v1080_v3, %v675_v48 }
 0x2e6   : > { %v1216_v59 = vpack.c.bf16 %v1208_v56, %v1207_v41 }
 0x2e9   : > { %v1362_v62 = vpop.f32.mrf.mxu0 }
 0x2ea   : > { %v1372_v22 = vmax.f32 %v1362_v62, 0.0 }
 0x2eb   : > { %v1202_v52 = vpop.f32.mrf.mxu3 }
 0x2ec   : > { %v1209_v4 = vmax.f32 %v1202_v52, 0.0 }
 0x2f1   : > { %v1364_v53 = vpop.f32.mrf.mxu0 }
 0x2f2   : > { %v1373_v38 = vmax.f32 %v1364_v53, 0.0 }
 0x2f3   : > { %v1204_v54 = vpop.f32.mrf.mxu3 }
 0x2f4   : > { %v1210_v55 = vmax.f32 %v1204_v54, 0.0  ;;  %v1381_v14 = vpack.c.bf16 %v1373_v38, %v1372_v22 }
 0x2f6   : > { %v1217_v45 = vpack.c.bf16 %v1210_v55, %v1209_v4 }
 0x2f8   : > { %1264 = vmatpush.bf16.msra.mxu1 %v1217_v45 }
 0x2f9   : > { %v1367_v58 = vpop.f32.mrf.mxu0 }
 0x2fa   : > { %v1374_v10 = vmax.f32 %v1367_v58, 0.0 }
 0x2fc   : > { %1265 = vmatpush.bf16.msra.mxu1 %v1216_v59 }
 0x2ff   : > { %2025 = vmatmul.msk.bf16.vlgmr.msra.gmra.mxu1 %vm515_vm0, %v2080_v1 }
 0x301   : > { %v1369_v39 = vpop.f32.mrf.mxu0 }
 0x302   : > { %v1375_v11 = vmax.f32 %v1369_v39, 0.0 }
 0x304   : > { %v1382_v18 = vpack.c.bf16 %v1375_v11, %v1374_v10 }
 0x306   : > { %1429 = vmatpush.bf16.msra.mxu2 %v1382_v18 }
 0x30a   : > { %1430 = vmatpush.bf16.msra.mxu2 %v1381_v14 }
 0x30d   : > { %2041 = vmatmul.msk.bf16.vlgmr.msra.gmra.mxu2 %vm515_vm0, %v2082_v23 }
 0x30f   : > { %2026 = vmatmul.msk.bf16.gmra.mxu1 %vm515_vm0, %v2081_v7 }
 0x31d   : > { %2042 = vmatmul.msk.bf16.gmra.mxu2 %vm515_vm0, %v2083_v60 }
 0x37c   : > { %v1267_v24 = vpop.f32.mrf.mxu1 }
 0x37d   : > { %v1268_v46 = vadd.f32 %v1267_v24, %v1225_v27 }
 0x37f   : > { %v1277_v29 = vadd.f32 %v1268_v46, %v2774_v25 }
 0x381   : > { %v1281_v31 = vmul.f32 0.5, %v1277_v29 }
 0x383   : > { %v1285_v35 = vmax.f32 %v1281_v31, 0.0 }
 0x384   : > { %v1269_v28 = vpop.f32.mrf.mxu1 }
 0x385   : > { %v1270_v32 = vadd.f32 %v1269_v28, %v2873_v15 }
 0x387   : > { %v1278_v2 = vadd.f32 %v1270_v32, %v2778_v26 }
 0x389   : > { %v1282_v19 = vmul.f32 0.5, %v1278_v2 }
 0x38b   : > { %v1286_v47 = vmax.f32 %v1282_v19, 0.0 }
 0x38c   : > { %v1272_v9 = vpop.f32.mrf.mxu1 }
 0x38d   : > { %v1273_v43 = vadd.f32 %v1272_v9, %v2865_v63 }
 0x38f   : > { %v1279_v48 = vadd.f32 %v1273_v43, %v2762_v16 }
 0x390   : > { %v1432_v30 = vpop.f32.mrf.mxu2 }
 0x391   : > { %v1433_v20 = vadd.f32 %v1432_v30, %v2875_v21 }
 0x393   : > { %v1442_v33 = vadd.f32 %v1433_v20, %v2774_v25 }
 0x394   : > { %v1274_v3 = vpop.f32.mrf.mxu1 }
 0x395   : > { %v1446_v34 = vmul.f32 0.5, %v1442_v33  ;;  %v1275_v63 = vadd.f32 %v1274_v3, %v2871_v12 }
 0x397   : > { %v1450_v61 = vmax.f32 %v1446_v34, 0.0  ;;  %v1280_v56 = vadd.f32 %v1275_v63, %v2766_v17 }
 0x398   : > { %v1434_v37 = vpop.f32.mrf.mxu2 }
 0x399   : > { %v1454_v40 = vadd.f32 %v1450_v61, %v1285_v35  ;;  %v1435_v8 = vadd.f32 %v1434_v37, %v1395_v36  ;;  %v1284_v39 = vmul.f32 0.5, %v1280_v56 }
 0x39b   : > { %v1458_v21 = vmul.f32 %v1454_v40, %v2752_v6  ;;  %v1443_v44 = vadd.f32 %v1435_v8, %v2778_v26  ;;  %v1283_v26 = vmul.f32 0.5, %v1279_v48  ;;  %v1288_v38 = vmax.f32 %v1284_v39, 0.0 }
 0x39d   : > { %v1447_v15 = vmul.f32 0.5, %v1443_v44  ;;  %v1462_v25 = vadd.f32 %v1458_v21, %v2884_v57  ;;  %v1287_v41 = vmax.f32 %v1283_v26, 0.0 }
 0x39f   : > { %v1451_v49 = vmax.f32 %v1447_v15, 0.0  ;;  %v1466_v50 = vmul.f32 0.33333334, %v1462_v25 }
 0x3a0   : > { %v1437_v62 = vpop.f32.mrf.mxu2 }
 0x3a1   : > { %v1455_v52 = vadd.f32 %v1451_v49, %v1286_v47  ;;  %v1438_v53 = vadd.f32 %v1437_v62, %v2867_v0  ;;  %1471 = vst.msk [vmem:[%s2930_s27] sm:$0xff] %vm1470_vm12, %v1466_v50 }
 0x3a3   : > { %v1459_v57 = vmul.f32 %v1455_v52, %v2752_v6  ;;  %v1444_v4 = vadd.f32 %v1438_v53, %v2762_v16 }
 0x3a5   : > { %v1448_v54 = vmul.f32 0.5, %v1444_v4  ;;  %v1463_v55 = vadd.f32 %v1459_v57, %v2890_v13 }
 0x3a7   : > { %v1452_v0 = vmax.f32 %v1448_v54, 0.0  ;;  %v1467_v45 = vmul.f32 0.33333334, %v1463_v55 }
 0x3a8   : > { %v1439_v58 = vpop.f32.mrf.mxu2 }
 0x3a9   : > { %v1456_v59 = vadd.f32 %v1452_v0, %v1287_v41  ;;  %v1440_v1 = vadd.f32 %v1439_v58, %v2869_v5  ;;  %1472 = vst.msk [vmem:[%s2930_s27 + $0x8] sm:$0xff] %vm1470_vm12, %v1467_v45  ;;  %v1477_v12 = vpack.c.bf16 %v1467_v45, %v1466_v50 }
 0x3ab   : > { %v1460_v16 = vmul.f32 %v1456_v59, %v2752_v6  ;;  %v1445_v10 = vadd.f32 %v1440_v1, %v2766_v17  ;;  %v2045_v17 = vld [vmem:[%s3159_s1 + $0xc] sm:$0xe] }
 0x3ad   : > { %v1464_v13 = vadd.f32 %v1460_v16, %v2897_v42  ;;  %v1449_v11 = vmul.f32 0.5, %v1445_v10  ;;  %v2084_v42 = vld [vmem:[%s3159_s1 + $0xc] sm:$0x10]  ;;  %s2968_s1 = sand.u32 1, %s3167_s17  }
 0x3ae   : > { %v2046_v24 = vor.u32 %v2084_v42, %v2045_v17  ;;  %s1514_s10 = scalar_lea.sflag [#allocation5], %s2968_s1 }
 0x3af   : > { %v1453_v18 = vmax.f32 %v1449_v11, 0.0  ;;  %v1468_v22 = vmul.f32 0.33333334, %v1464_v13 }
 0x3b0   : > { %v1490_v27 = vrot.slane %v2046_v24, 1 }
 0x3b1   : > { %v1457_v14 = vadd.f32 %v1453_v18, %v1288_v38  ;;  %1473 = vst.msk [vmem:[%s2930_s27 + $0x10] sm:$0xff] %vm1470_vm12, %v1468_v22 }
 0x3b3   : > { %v1461_v5 = vmul.f32 %v1457_v14, %v2752_v6 }
 0x3b5   : > { %v1465_v23 = vadd.f32 %v1461_v5, %v2900_v51 }
 0x3b7   : > { %v1469_v7 = vmul.f32 0.33333334, %v1465_v23 }
 0x3b9   : > { %v1478_v60 = vpack.c.bf16 %v1469_v7, %v1468_v22  ;;  %1474 = vst.msk [vmem:[%s2930_s27 + $0x18] sm:$0xff] %vm1470_vm12, %v1469_v7 }
 0x3bb   : > { %1500 = vmatpush.bf16.msrb.mxu3 %v1478_v60 }
 0x3bf   : > { %1501 = vmatpush.bf16.msrb.mxu3 %v1477_v12 }
 0x3c2   : > { %2047 = vmatmul.msk.bf16.vlgmr.msrb.gmra.mxu3 %vm515_vm0, %v1490_v27 }
 0x3c3   : > { %2232 = shalt.err (!%p2229_p5)
}
 0x3c4   : > { %2087 = dma.vmem_to_hbm [thread:$0]  (%p2579_p4), %s1571_s22, 32, %s1573_s15, %s1514_s10  }
 0x3c5   : > { %s1600_s3 = sshll.u32 %s2836_s20, 4  ;;  %s1602_s12 = sshll.u32 %s1598_s4, 4  ;;  %s1601_s3 = int_to_ptr.vmem [resolvable:$true] %s1600_s3  ;;  %s1603_s12 = int_to_ptr.hbm [resolvable:$true] %s1602_s12 }
 0x3c6   : > { %s1524_s21 = scalar_lea.sflag [#allocation8], %s2968_s1  ;;  %s2247_s17 = sshra.s32 %s1603_s12, 4  ;;  %s2248_s17 = int_to_ptr.hbm [resolvable:$true] %s2247_s17 }
 0x3c7   : > { %s2249_s5 = scalar_lea.hbm %s2248_s17, 4  ;;  %s2253_s18 = scalar_lea.hbm %s3122_s9, 8 }
 0x3c8   : > { %p2250_p6 = scmp.ne.s32.totalorder %s2248_s17, %s2249_s5  ;;  %p2254_p10 = scmp.lt.s32.totalorder %s2248_s17, %s3122_s9 }
 0x3c9   : > { %p2255_p11 = scmp.lt.s32.totalorder %s2253_s18, %s2249_s5 }
 0x3ca   : > { %p2251_p7 = pnand %p2250_p6, %p2579_p4 }
 0x3cb   : > { %p2256_p12 = por %p2255_p11, %p2254_p10 }
 0x3cc   : > { %p2252_p9 = pneg %p2251_p7 }
 0x3ce   : > { %p2257_p13 = pnand %p2256_p12, %p2252_p9 }
 0x3d0   : > { %2260 = shalt.err (!%p2257_p13)
}
 0x3d1   : > { %2089 = dma.vmem_to_hbm [thread:$0]  (%p2579_p4), %s1601_s3, 64, %s1603_s12, %s1524_s21  }
 0x3d2   : > { %s3004_s22 = sshll.u32 %s2455_s24, 3  ;;  %s1630_s25 = sshll.u32 %s2826_s28, 4  ;;  %s1631_s25 = int_to_ptr.vmem [resolvable:$true] %s1630_s25 }
 0x3d3   : > { %s1628_s4 = scalar_lea.hbm %s3124_s11, %s3004_s22  ;;  %s1534_s5 = scalar_lea.sflag [#allocation11], %s2968_s1 }
 0x3d4   : > { %s1632_s17 = sshll.u32 %s1628_s4, 4  ;;  %s2281_s18 = scalar_lea.hbm %s3124_s11, 16  ;;  %s1633_s17 = int_to_ptr.hbm [resolvable:$true] %s1632_s17 }
 0x3d5   : > { %s2275_s16 = sshra.s32 %s1633_s17, 4  ;;  %s2276_s16 = int_to_ptr.hbm [resolvable:$true] %s2275_s16 }
 0x3d6   : > { %s2277_s23 = scalar_lea.hbm %s2276_s16, 8  ;;  %p2282_p3 = scmp.lt.s32.totalorder %s2276_s16, %s3124_s11 }
 0x3d7   : > { %p2278_p0 = scmp.ne.s32.totalorder %s2276_s16, %s2277_s23  ;;  %p2283_p5 = scmp.lt.s32.totalorder %s2281_s18, %s2277_s23 }
 0x3d9   : > { %p2279_p1 = pnand %p2278_p0, %p2579_p4  ;;  %p2284_p6 = por %p2283_p5, %p2282_p3 }
 0x3db   : > { %p2280_p2 = pneg %p2279_p1 }
 0x3dd   : > { %p2285_p7 = pnand %p2284_p6, %p2280_p2 }
 0x3df   : > { %2288 = shalt.err (!%p2285_p7)
}
 0x3e0   : > { %2091 = dma.vmem_to_hbm [thread:$0]  (%p2579_p4), %s1631_s25, 128, %s1633_s17, %s1534_s5  }
 0x3e1   : > { %s2085_s28 = sshll.u32 %s2455_s24, 5  ;;  %s1552_s15 = sshll.u32 %s2930_s27, 4  ;;  %s1553_s15 = int_to_ptr.vmem [resolvable:$true] %s1552_s15 }
 0x3e2   : > { %s1551_s3 = scalar_lea.hbm %s3119_s6, %s2085_s28  ;;  %s1509_s23 = scalar_lea.sflag [#allocation3], %s2662_s0 }
 0x3e3   : > { %s1554_s16 = sshll.u32 %s1551_s3, 4  ;;  %s2309_s24 = scalar_lea.hbm %s3119_s6, 64  ;;  %s1555_s16 = int_to_ptr.hbm [resolvable:$true] %s1554_s16 }
 0x3e4   : > { %s2303_s12 = sshra.s32 %s1555_s16, 4  ;;  %s2304_s12 = int_to_ptr.hbm [resolvable:$true] %s2303_s12 }
 0x3e5   : > { %s2305_s18 = scalar_lea.hbm %s2304_s12, 32  ;;  %p2310_p12 = scmp.lt.s32.totalorder %s2304_s12, %s3119_s6 }
 0x3e6   : > { %p2306_p9 = scmp.ne.s32.totalorder %s2304_s12, %s2305_s18  ;;  %p2311_p13 = scmp.lt.s32.totalorder %s2309_s24, %s2305_s18 }
 0x3e8   : > { %p2307_p10 = pnand %p2306_p9, %p2579_p4  ;;  %p2312_p0 = por %p2311_p13, %p2310_p12 }
 0x3ea   : > { %p2308_p11 = pneg %p2307_p10 }
 0x3ec   : > { %p2313_p1 = pnand %p2312_p0, %p2308_p11 }
 0x3ee   : > { %2316 = shalt.err (!%p2313_p1)
}
 0x3ef   : > { %s2470_s0 = smov 128   ;;  %s2471_s17 = smov 8  }
 0x3f0   : > { %2086 = dma.vmem_to_hbm [thread:$0]  (%p2579_p4), %s1553_s15, 512, %s1555_s16, %s1509_s23, %s2470_s0, %s2470_s0, %s2471_s17  }
 0x3f1   : > { %s1585_s28 = sshll.u32 %s2728_s19, 4  ;;  %s1587_s20 = sshll.u32 %s2974_s14, 4  ;;  %s1586_s28 = int_to_ptr.vmem [resolvable:$true] %s1585_s28  ;;  %s1588_s20 = int_to_ptr.hbm [resolvable:$true] %s1587_s20 }
 0x3f2   : > { %s2331_s4 = sshra.s32 %s1588_s20, 4  ;;  %s2337_s29 = scalar_lea.hbm %s3121_s8, 8  ;;  %s2332_s4 = int_to_ptr.hbm [resolvable:$true] %s2331_s4 }
 0x3f3   : > { %s2333_s3 = scalar_lea.hbm %s2332_s4, 4  ;;  %p2338_p6 = scmp.lt.s32.totalorder %s2332_s4, %s3121_s8 }
 0x3f4   : > { %p2334_p2 = scmp.ne.s32.totalorder %s2332_s4, %s2333_s3  ;;  %p2339_p7 = scmp.lt.s32.totalorder %s2337_s29, %s2333_s3 }
 0x3f6   : > { %p2335_p3 = pnand %p2334_p2, %p2579_p4  ;;  %p2340_p9 = por %p2339_p7, %p2338_p6 }
 0x3f8   : > { %p2336_p5 = pneg %p2335_p3 }
 0x3fa   : > { %p2341_p10 = pnand %p2340_p9, %p2336_p5 }
 0x3fc   : > { %2344 = shalt.err (!%p2341_p10)
}
 0x3fd   : > { %2088 = dma.vmem_to_hbm [thread:$0]  (%p2579_p4), %s1586_s28, 64, %s1588_s20, %s1514_s10  }
 0x3fe   : > { %s3168_s15 = sld [smem:[#allocation31_spill]]  ;;  %s1615_s23 = sshll.u32 %s2733_s30, 4  ;;  %s1616_s23 = int_to_ptr.vmem [resolvable:$true] %s1615_s23 }
 0x404   : > { %s1613_s16 = scalar_lea.hbm %s3168_s15, %s3004_s22  ;;  %s2365_s3 = scalar_lea.hbm %s3168_s15, 16 }
 0x405   : > { %s1617_s27 = sshll.u32 %s1613_s16, 4  ;;  %s1618_s27 = int_to_ptr.hbm [resolvable:$true] %s1617_s27 }
 0x406   : > { %s2359_s25 = sshra.s32 %s1618_s27, 4  ;;  %s2360_s25 = int_to_ptr.hbm [resolvable:$true] %s2359_s25 }
 0x407   : > { %s2361_s0 = scalar_lea.hbm %s2360_s25, 8  ;;  %p2366_p0 = scmp.lt.s32.totalorder %s2360_s25, %s3168_s15 }
 0x408   : > { %p2362_p11 = scmp.ne.s32.totalorder %s2360_s25, %s2361_s0  ;;  %p2367_p1 = scmp.lt.s32.totalorder %s2365_s3, %s2361_s0 }
 0x40a   : > { %p2363_p12 = pnand %p2362_p11, %p2579_p4  ;;  %p2368_p2 = por %p2367_p1, %p2366_p0 }
 0x40c   : > { %p2364_p13 = pneg %p2363_p12 }
 0x40e   : > { %p2369_p3 = pnand %p2368_p2, %p2364_p13 }
 0x410   : > { %2372 = shalt.err (!%p2369_p3)
}
 0x411   : > { %s3169_s30 = sld [smem:[#allocation24_spill]]  ;;  %v1483_v6 = vpop.permute.xlu0 %1482 }
 0x412   : > { %2090 = dma.vmem_to_hbm [thread:$0]  (%p2579_p4), %s1616_s23, 128, %s1618_s27, %s1524_s21  }
 0x413   : > { %s3170_s18 = sld [smem:[#allocation32_spill]] }
 0x417   : > { %s492_s2 = scalar_lea.vmem [#allocation12], %s3169_s30 }
 0x418   : > { %s1645_s24 = sshll.u32 %s492_s2, 4  ;;  %s1646_s24 = int_to_ptr.vmem [resolvable:$true] %s1645_s24 }
 0x419   : > { %s1643_s29 = scalar_lea.hbm %s3170_s18, %s3004_s22  ;;  %s2393_s22 = scalar_lea.hbm %s3170_s18, 16 }
 0x41a   : > { %s1647_s14 = sshll.u32 %s1643_s29, 4  ;;  %s1648_s14 = int_to_ptr.hbm [resolvable:$true] %s1647_s14 }
 0x41b   : > { %s2387_s19 = sshra.s32 %s1648_s14, 4  ;;  %s2388_s19 = int_to_ptr.hbm [resolvable:$true] %s2387_s19 }
 0x41c   : > { %s2389_s16 = scalar_lea.hbm %s2388_s19, 8  ;;  %p2394_p9 = scmp.lt.s32.totalorder %s2388_s19, %s3170_s18 }
 0x41d   : > { %p2390_p5 = scmp.ne.s32.totalorder %s2388_s19, %s2389_s16  ;;  %p2395_p10 = scmp.lt.s32.totalorder %s2393_s22, %s2389_s16 }
 0x41f   : > { %p2391_p6 = pnand %p2390_p5, %p2579_p4  ;;  %p2396_p11 = por %p2395_p10, %p2394_p9 }
 0x421   : > { %p2392_p7 = pneg %p2391_p6 }
 0x423   : > { %p2397_p12 = pnand %p2396_p11, %p2392_p7 }
 0x445   : > { %v1503_v51 = vpop.f32.mrf.mxu3 }
 0x446   : > { %v1504_v46 = vadd.f32 %v1503_v51, %v1483_v6 }
 0x448   : > { %1507 = vst.msk [vmem:[%s492_s2] sm:$0xff] %vm1470_vm12, %v1504_v46 }
 0x449   : > { %2400 = shalt.err (!%p2397_p12)
}
 0x44a   : > { %2092 = dma.vmem_to_hbm [thread:$0]  (%p2579_p4), %s1646_s24, 128, %s1648_s14, %s1534_s5  }
 0x44d   : > { %v1505_v28 = vpop.f32.mrf.mxu3 }
 0x44e PF: > { %s3171_s0 = sld [smem:[#allocation17_spill]]  ;;  %p2122_p13 = scmp.ge.s32.totalorder %s2463_s26, 2 }
 0x450   : > { %p2101_p0 = pnand %p2122_p13, %p2588_p8 }
 0x452   : > { %p2102_p1 = pneg %p2101_p0 }
 0x454   : > { %s1659_s4 = sand.u32 1, %s3171_s0  }
 0x455   : > { %s1660_s3 = scalar_lea.sflag [#allocation3], %s1659_s4 }
 0x456   : > { %2426 = dma.done.wait (%p2102_p1), %s1660_s3, 512  }
 0x457   : > { %2428 = vsyncadd (%p2102_p1), %s1660_s3, 4294966784  ;;  %s3173_s10 = sadd.s32 4294967294, %s2463_s26  }
 0x458   : > { %s1669_s28 = sand.u32 1, %s3173_s10  }
 0x459   : > { %s1670_s13 = scalar_lea.sflag [#allocation5], %s1669_s28 }
 0x45a   : > { %2430 = dma.done.wait (%p2102_p1), %s1670_s13, 96  }
 0x45b   : > { %2432 = vsyncadd (%p2102_p1), %s1670_s13, 4294967200  ;;  %s1690_s1 = scalar_lea.sflag [#allocation8], %s1669_s28 }
 0x45c   : > { %2434 = dma.done.wait (%p2102_p1), %s1690_s1, 192  }
 0x45d   : > { %2436 = vsyncadd (%p2102_p1), %s1690_s1, 4294967104  ;;  %s1710_s5 = scalar_lea.sflag [#allocation11], %s1669_s28 }
 0x45e   : > { %2438 = dma.done.wait (%p2102_p1), %s1710_s5, 256  }
 0x45f   : > { %2440 = vsyncadd (%p2102_p1), %s1710_s5, 4294967040  ;;  %s35_s26 = sadd.s32 1, %s2463_s26   ;;  %s3174_s21 = sld [smem:[#allocation18_spill]] }
 0x460   : > { %p32_p4 = scmp.ge.s32.totalorder %s35_s26, 4   ;;  %s3175_s22 = sld [smem:[#allocation19_spill]] }
 0x461   : > { %s3176_s23 = sld [smem:[#allocation23_spill]] }
 0x462   : > { %s3177_s24 = sld [smem:[#allocation20_spill]]  ;;  %34 = sbr.rel (!%p32_p4) target bundleno = 19 (0x13), region = 179 }
 0x463   : > { %s3178_s25 = sld [smem:[#allocation21_spill]] }
 0x467   :  { %1726 = vsyncpa [#allocation3], 1 }
 0x468   :  { %1728 = vsyncpa [#allocation3 + $0x1], 1 }
 0x469   :  { %1729 = vsyncpa [#allocation5], 1 }
 0x46a   :  { %1731 = vsyncpa [#allocation5 + $0x1], 1 }
 0x46b   :  { %1732 = vsyncpa [#allocation8], 1 }
 0x46c   :  { %1734 = vsyncpa [#allocation8 + $0x1], 1 }
 0x46d   :  { %1735 = vsyncpa [#allocation11], 1 }
 0x46e   :  { %1737 = vsyncpa [#allocation11 + $0x1], 1 }

</bundles_post_ra>
